<compile_context>
chip_gen: v7x
topology: tpu7x:2x2x1
jax: 0.10.0
libtpu: 0.0.40
codegen_flags: <defaults>
</compile_context>

<pallas_src>
import functools

import jax
import jax.numpy as jnp
from jax.experimental import pallas as pl
from jax.experimental.pallas import tpu as pltpu


_FMA_MAX_D = 8    # contractions with K <= this stay on the VPU (broadcast FMA)
_R_CHUNK = 256    # rows of the ReLU layer processed per accumulation chunk


def _round_up(x, m):
    return -(-int(x) // m) * m


def _small_k_mm(mat, x):
    """(rows, D) @ (D, Tn) for tiny D via VPU broadcast FMAs (no MXU)."""
    acc = mat[:, 0:1] * x[0:1, :]
    for d in range(1, x.shape[0]):
        acc = acc + mat[:, d:d + 1] * x[d:d + 1, :]
    return acc


def _apply_block(x, w, bw, v, c, bvc, *, v_is_col):
    """One ReLULinearSkipBlock on a lane-dense activation tile.

    x   : (D, Tn)  activation, batch on lanes, f32
    w   : (R, D)   relu-layer weight (PyTorch (out, in) layout)
    bw  : (R, 1)   relu-layer bias (column -> broadcasts over lanes)
    v   : (R, 1) if v_is_col (i.e. L == 1) else (L, R)
    c   : (L, D)
    bvc : (L, 1)   precombined bV + bC
    returns (L, Tn) float32
    """
    D = x.shape[0]
    R = w.shape[0]
    use_fma = D <= _FMA_MAX_D

    if use_fma:
        skip = _small_k_mm(c.astype(jnp.float32), x)
    else:
        skip = jnp.dot(c, x.astype(c.dtype), preferred_element_type=jnp.float32)
    out = skip + bvc

    rc = _R_CHUNK if R > _R_CHUNK else R
    for r0 in range(0, R, rc):
        r1 = min(r0 + rc, R)
        wc = w[r0:r1]
        if use_fma:
            h = _small_k_mm(wc.astype(jnp.float32), x)
        else:
            h = jnp.dot(wc, x.astype(wc.dtype),
                        preferred_element_type=jnp.float32)
        h = jnp.maximum(h + bw[r0:r1], 0.0)
        if v_is_col:
            # L == 1: broadcast-mul + cross-sublane reduce (VPU/XLU slots).
            out = out + jnp.sum(v[r0:r1] * h, axis=0, keepdims=True)
        else:
            out = out + jnp.dot(v[:, r0:r1], h.astype(v.dtype),
                                preferred_element_type=jnp.float32)
    return out


def _model_kernel(v_col_flags, *refs):
    """Fused forward over all blocks for one batch tile.

    refs = (x_ref, [w, bw, v, c, bvc] * num_layers, o_ref)
    """
    x_ref, o_ref = refs[0], refs[-1]
    layer_refs = refs[1:-1]
    x = x_ref[...].astype(jnp.float32)              # (D, Tn)
    for li, v_is_col in enumerate(v_col_flags):
        w_ref, bw_ref, v_ref, c_ref, bvc_ref = layer_refs[5 * li:5 * li + 5]
        x = _apply_block(x, w_ref[...], bw_ref[...], v_ref[...], c_ref[...],
                         bvc_ref[...], v_is_col=v_is_col)
    o_ref[...] = x.astype(o_ref.dtype)              # lane-dense (L, Tn) store


def _choose_tile_n(n, *, cap=4096, target_tiles=2):
    """Pick a lane-dense (multiple of 128) batch-tile size.

    The batch is padded to a multiple of 128 first so odd N never produces
    lane-masked stores.  We aim for `target_tiles` grid steps (2 keeps both
    v7x TensorCores busy while per-step overhead stays ~0.7 us; on v5e/v6e the
    extra step vs grid=1 costs only ~0.35 us).  Pass tile_n explicitly to
    force grid=1 on single-TensorCore chips.
    """
    np128 = _round_up(max(int(n), 1), 128)
    if np128 // target_tiles < 128:
        return min(np128, cap)
    return min(_round_up(-(-np128 // target_tiles), 128), cap)


def prepare_params(raw_params, *, mxu_dtype=jnp.float32):
    """One-time conversion of PyTorch-layout params to kernel-ready form.

    mxu_dtype=jnp.bfloat16 casts the MXU-path weights (d_in > 8 / L > 1) for
    ~3x MXU throughput on v6e/v7x; default keeps f32 (tightest accuracy).
    """
    prepped = []
    for (W, bW, V, bV, C, bC) in raw_params:
        R, d_in = W.shape
        L = V.shape[0]
        w = jnp.asarray(W, jnp.float32)
        c = jnp.asarray(C, jnp.float32)
        if d_in > _FMA_MAX_D:                      # MXU path for W / C
            w = w.astype(mxu_dtype)
            c = c.astype(mxu_dtype)
        if L == 1:
            # Column form for the VPU broadcast-mul + sublane-reduce path.
            v = jnp.asarray(V, jnp.float32).reshape(R, 1)
        else:
            v = jnp.asarray(V, jnp.float32).astype(mxu_dtype)
        prepped.append((
            w,                                               # (R, D)
            jnp.asarray(bW, jnp.float32).reshape(R, 1),      # (R, 1)
            v,                                               # (R,1) or (L,R)
            c,                                               # (L, D)
            (jnp.asarray(bV, jnp.float32)
             + jnp.asarray(bC, jnp.float32)).reshape(L, 1),  # folded bias
        ))
    return prepped


def model_forward(x, params, *, tile_n=None):
    """Run the whole block stack in one fused pallas_call.

    x: (N, D) float32.  params: output of prepare_params() (raw 6-tuples are
    accepted and converted on the fly).  Returns (N, L_last) float32.
    Wrap with jax.jit(..., static_argnames=("tile_n",)) so the transpose/pad
    and the output slice fuse into single XLA ops around the pallas_call.
    """
    if params and len(params[0]) == 6:
        params = prepare_params(params)

    N, D = x.shape
    L_out = params[-1][4].shape[0]

    if tile_n is None:
        tile_n = _choose_tile_n(N)
    grid_n = -(-N // tile_n)
    Np = grid_n * tile_n

    # Batch on lanes; padded columns are zeros -> finite garbage outputs that
    # are sliced off below (no exp/log in this model, so no NaN risk).
    xt = x.T                                        # (D, N)
    if Np != N:
        xt = jnp.pad(xt, ((0, 0), (0, Np - N)))

    in_specs = [pl.BlockSpec((D, tile_n), lambda i: (0, i))]
    flat_args = [xt]
    v_col_flags = []
    flops = 0
    bytes_accessed = Np * D * 4 + Np * L_out * 4
    for (w, bw, v, c, bvc) in params:
        r, d_in = w.shape
        l_out = bvc.shape[0]
        v_col_flags.append(l_out == 1)
        for arr in (w, bw, v, c, bvc):
            # Constant index_map -> each weight is DMA'd once; default double
            # buffering only costs a few KB at these sizes, so we keep it.
            in_specs.append(pl.BlockSpec(arr.shape, lambda i: (0, 0)))
            flat_args.append(arr)
            bytes_accessed += int(arr.size) * arr.dtype.itemsize
        flops += 2 * Np * (d_in * r + r * l_out + d_in * l_out)

    kernel = functools.partial(_model_kernel, tuple(v_col_flags))

    out_t = pl.pallas_call(
        kernel,
        out_shape=jax.ShapeDtypeStruct((L_out, Np), jnp.float32),
        grid_spec=pltpu.PrefetchScalarGridSpec(
            num_scalar_prefetch=0,
            grid=(grid_n,),
            in_specs=in_specs,
            out_specs=pl.BlockSpec((L_out, tile_n), lambda i: (0, i)),
        ),
        compiler_params=pltpu.CompilerParams(
            dimension_semantics=("parallel",)),
        cost_estimate=pl.CostEstimate(
            flops=int(flops), transcendentals=0,
            bytes_accessed=int(bytes_accessed)),
    )(*flat_args)

    if L_out == 1:
        return out_t[0, :N][:, None]     # slice + reshape: no transpose copy
    return out_t[:, :N].T


def init_model_params(key, D=2, relu_width=320, linear_width=160, layers=1):
    """Deterministic params matching the PyTorch module's shapes/init style."""
    params = []
    for bi in range(layers):
        d_in = D if bi == 0 else linear_width
        out = 1 if bi == layers - 1 else linear_width
        key, *ks = jax.random.split(key, 7)
        W = jax.random.uniform(ks[0], (relu_width, d_in), jnp.float32)
        V = jax.random.uniform(ks[1], (out, relu_width), jnp.float32)
        C = jax.random.uniform(ks[2], (out, d_in), jnp.float32)
        bW = jax.random.uniform(ks[3], (relu_width,), jnp.float32,
                                -1.0 / jnp.sqrt(d_in), 1.0 / jnp.sqrt(d_in))
        bV = jax.random.uniform(ks[4], (out,), jnp.float32,
                                -1.0 / jnp.sqrt(relu_width),
                                1.0 / jnp.sqrt(relu_width))
        bC = jax.random.uniform(ks[5], (out,), jnp.float32,
                                -1.0 / jnp.sqrt(d_in), 1.0 / jnp.sqrt(d_in))
        params.append((W, bW, V, bV, C, bC))
    return params


def model_forward_ref(x, raw_params):
    """Pure-JAX reference (highest matmul precision) for correctness checks."""
    hi = jax.lax.Precision.HIGHEST
    for (W, bW, V, bV, C, bC) in raw_params:
        h = jnp.maximum(jnp.dot(x, W.T, precision=hi) + bW, 0.0)
        x = jnp.dot(h, V.T, precision=hi) + bV \
            + (jnp.dot(x, C.T, precision=hi) + bC)
    return x


if __name__ == "__main__":
    key = jax.random.PRNGKey(0)
    k_x, k_p, k_x2, k_p2 = jax.random.split(key, 4)

    fwd = jax.jit(model_forward, static_argnames=("tile_n",))

    # --- Test 1: module defaults (D=2, relu 320, 1 layer, scalar output) ----
    D, relu_width, linear_width, layers = 2, 320, 160, 1
    N = 512                               # -> 2 lane-dense 256-wide batch tiles
    x = jax.random.normal(k_x, (N, D), dtype=jnp.float32)
    raw_params = init_model_params(k_p, D=D, relu_width=relu_width,
                                   linear_width=linear_width, layers=layers)
    params = prepare_params(raw_params)   # done once, not per forward call
    out = jax.block_until_ready(fwd(x, params))
    ref = model_forward_ref(x, raw_params)
    assert out.shape == (N, 1), out.shape
    assert jnp.allclose(out, ref, rtol=5e-4, atol=5e-3), (
        f"max abs err {jnp.max(jnp.abs(out - ref))}")

    # --- Test 2: multi-layer config exercising MXU + chunked-R + odd batch --
    D2, rw2, lw2, layers2 = 2, 64, 32, 3
    N2 = 300                              # odd batch -> exercises 128-padding
    x2 = jax.random.normal(k_x2, (N2, D2), dtype=jnp.float32)
    raw_params2 = init_model_params(k_p2, D=D2, relu_width=rw2,
                                    linear_width=lw2, layers=layers2)
    params2 = prepare_params(raw_params2)
    out2 = jax.block_until_ready(fwd(x2, params2))
    ref2 = model_forward_ref(x2, raw_params2)
    assert out2.shape == (N2, 1), out2.shape
    rel_err = jnp.max(jnp.abs(out2 - ref2)) / jnp.maximum(
        jnp.max(jnp.abs(ref2)), 1.0)
    assert rel_err < 1e-2, f"relative err {rel_err}"

    print("KERNEL_OK")
</pallas_src>

<mosaic_0001>
module attributes {stable_mosaic.version = 11 : i64} {
  func.func @_model_kernel(%arg0: i32, %arg1: memref<2x256xf32, #tpu.memory_space<vmem>>, %arg2: memref<320x2xf32, #tpu.memory_space<vmem>>, %arg3: memref<320x1xf32, #tpu.memory_space<vmem>>, %arg4: memref<320x1xf32, #tpu.memory_space<vmem>>, %arg5: memref<1x2xf32, #tpu.memory_space<vmem>>, %arg6: memref<1x1xf32, #tpu.memory_space<vmem>>, %arg7: memref<1x256xf32, #tpu.memory_space<vmem>>) attributes {dimension_semantics = [#tpu.dimension_semantics<parallel>], iteration_bounds = array<i64: 2>, scalar_prefetch = 0 : i64, scratch_operands = 0 : i64, tpu.core_type = #tpu.core_type<tc>, window_params = [{transform_indices = @transform_0, window_bounds = array<i64: 2, 256>}, {pipeline_mode = #tpu.pipeline_mode<synchronous>, transform_indices = @transform_1, window_bounds = array<i64: 320, 2>}, {pipeline_mode = #tpu.pipeline_mode<synchronous>, transform_indices = @transform_2, window_bounds = array<i64: 320, 1>}, {pipeline_mode = #tpu.pipeline_mode<synchronous>, transform_indices = @transform_3, window_bounds = array<i64: 320, 1>}, {pipeline_mode = #tpu.pipeline_mode<synchronous>, transform_indices = @transform_4, window_bounds = array<i64: 1, 2>}, {pipeline_mode = #tpu.pipeline_mode<synchronous>, transform_indices = @transform_5, window_bounds = array<i64: 1, 1>}, {transform_indices = @transform_6, window_bounds = array<i64: 1, 256>}]} {
    %c0 = arith.constant 0 : index
    %c0_0 = arith.constant 0 : index
    %0 = vector.load %arg1[%c0, %c0_0] : memref<2x256xf32, #tpu.memory_space<vmem>>, vector<2x256xf32>
    %c0_1 = arith.constant 0 : index
    %c0_2 = arith.constant 0 : index
    %1 = vector.load %arg2[%c0_1, %c0_2] : memref<320x2xf32, #tpu.memory_space<vmem>>, vector<320x2xf32>
    %c0_3 = arith.constant 0 : index
    %c0_4 = arith.constant 0 : index
    %2 = vector.load %arg3[%c0_3, %c0_4] : memref<320x1xf32, #tpu.memory_space<vmem>>, vector<320x1xf32>
    %c0_5 = arith.constant 0 : index
    %c0_6 = arith.constant 0 : index
    %3 = vector.load %arg4[%c0_5, %c0_6] : memref<320x1xf32, #tpu.memory_space<vmem>>, vector<320x1xf32>
    %c0_7 = arith.constant 0 : index
    %c0_8 = arith.constant 0 : index
    %4 = vector.load %arg5[%c0_7, %c0_8] : memref<1x2xf32, #tpu.memory_space<vmem>>, vector<1x2xf32>
    %c0_9 = arith.constant 0 : index
    %c0_10 = arith.constant 0 : index
    %5 = vector.load %arg6[%c0_9, %c0_10] : memref<1x1xf32, #tpu.memory_space<vmem>>, vector<1x1xf32>
    %6 = vector.extract_strided_slice %4 {offsets = [0, 0], sizes = [1, 1], strides = [1, 1]} : vector<1x2xf32> to vector<1x1xf32>
    %7 = vector.extract_strided_slice %0 {offsets = [0, 0], sizes = [1, 256], strides = [1, 1]} : vector<2x256xf32> to vector<1x256xf32>
    %8 = vector.broadcast %6 : vector<1x1xf32> to vector<1x256xf32>
    %9 = arith.mulf %8, %7 : vector<1x256xf32>
    %10 = vector.extract_strided_slice %4 {offsets = [0, 1], sizes = [1, 1], strides = [1, 1]} : vector<1x2xf32> to vector<1x1xf32>
    %11 = vector.extract_strided_slice %0 {offsets = [1, 0], sizes = [1, 256], strides = [1, 1]} : vector<2x256xf32> to vector<1x256xf32>
    %12 = vector.broadcast %10 : vector<1x1xf32> to vector<1x256xf32>
    %13 = arith.mulf %12, %11 : vector<1x256xf32>
    %14 = arith.addf %9, %13 : vector<1x256xf32>
    %15 = vector.broadcast %5 : vector<1x1xf32> to vector<1x256xf32>
    %16 = arith.addf %14, %15 : vector<1x256xf32>
    %17 = vector.extract_strided_slice %1 {offsets = [0, 0], sizes = [256, 2], strides = [1, 1]} : vector<320x2xf32> to vector<256x2xf32>
    %18 = vector.extract_strided_slice %17 {offsets = [0, 0], sizes = [256, 1], strides = [1, 1]} : vector<256x2xf32> to vector<256x1xf32>
    %19 = vector.extract_strided_slice %0 {offsets = [0, 0], sizes = [1, 256], strides = [1, 1]} : vector<2x256xf32> to vector<1x256xf32>
    %20 = vector.broadcast %18 : vector<256x1xf32> to vector<256x256xf32>
    %21 = vector.broadcast %19 : vector<1x256xf32> to vector<256x256xf32>
    %22 = arith.mulf %20, %21 : vector<256x256xf32>
    %23 = vector.extract_strided_slice %17 {offsets = [0, 1], sizes = [256, 1], strides = [1, 1]} : vector<256x2xf32> to vector<256x1xf32>
    %24 = vector.extract_strided_slice %0 {offsets = [1, 0], sizes = [1, 256], strides = [1, 1]} : vector<2x256xf32> to vector<1x256xf32>
    %25 = vector.broadcast %23 : vector<256x1xf32> to vector<256x256xf32>
    %26 = vector.broadcast %24 : vector<1x256xf32> to vector<256x256xf32>
    %27 = arith.mulf %25, %26 : vector<256x256xf32>
    %28 = arith.addf %22, %27 : vector<256x256xf32>
    %29 = vector.extract_strided_slice %2 {offsets = [0, 0], sizes = [256, 1], strides = [1, 1]} : vector<320x1xf32> to vector<256x1xf32>
    %30 = vector.broadcast %29 : vector<256x1xf32> to vector<256x256xf32>
    %31 = arith.addf %28, %30 : vector<256x256xf32>
    %cst = arith.constant 0.000000e+00 : f32
    %32 = vector.broadcast %cst : f32 to vector<256x256xf32>
    %33 = arith.maximumf %31, %32 : vector<256x256xf32>
    %34 = vector.extract_strided_slice %3 {offsets = [0, 0], sizes = [256, 1], strides = [1, 1]} : vector<320x1xf32> to vector<256x1xf32>
    %35 = vector.broadcast %34 : vector<256x1xf32> to vector<256x256xf32>
    %36 = arith.mulf %35, %33 : vector<256x256xf32>
    %cst_11 = arith.constant dense<0.000000e+00> : vector<256xf32>
    %37 = vector.multi_reduction <add>, %36, %cst_11 [0] : vector<256x256xf32> to vector<256xf32>
    %38 = vector.shape_cast %37 : vector<256xf32> to vector<1x256xf32>
    %39 = arith.addf %16, %38 : vector<1x256xf32>
    %40 = vector.extract_strided_slice %1 {offsets = [256, 0], sizes = [64, 2], strides = [1, 1]} : vector<320x2xf32> to vector<64x2xf32>
    %41 = vector.extract_strided_slice %40 {offsets = [0, 0], sizes = [64, 1], strides = [1, 1]} : vector<64x2xf32> to vector<64x1xf32>
    %42 = vector.extract_strided_slice %0 {offsets = [0, 0], sizes = [1, 256], strides = [1, 1]} : vector<2x256xf32> to vector<1x256xf32>
    %43 = vector.broadcast %41 : vector<64x1xf32> to vector<64x256xf32>
    %44 = vector.broadcast %42 : vector<1x256xf32> to vector<64x256xf32>
    %45 = arith.mulf %43, %44 : vector<64x256xf32>
    %46 = vector.extract_strided_slice %40 {offsets = [0, 1], sizes = [64, 1], strides = [1, 1]} : vector<64x2xf32> to vector<64x1xf32>
    %47 = vector.extract_strided_slice %0 {offsets = [1, 0], sizes = [1, 256], strides = [1, 1]} : vector<2x256xf32> to vector<1x256xf32>
    %48 = vector.broadcast %46 : vector<64x1xf32> to vector<64x256xf32>
    %49 = vector.broadcast %47 : vector<1x256xf32> to vector<64x256xf32>
    %50 = arith.mulf %48, %49 : vector<64x256xf32>
    %51 = arith.addf %45, %50 : vector<64x256xf32>
    %52 = vector.extract_strided_slice %2 {offsets = [256, 0], sizes = [64, 1], strides = [1, 1]} : vector<320x1xf32> to vector<64x1xf32>
    %53 = vector.broadcast %52 : vector<64x1xf32> to vector<64x256xf32>
    %54 = arith.addf %51, %53 : vector<64x256xf32>
    %cst_12 = arith.constant 0.000000e+00 : f32
    %55 = vector.broadcast %cst_12 : f32 to vector<64x256xf32>
    %56 = arith.maximumf %54, %55 : vector<64x256xf32>
    %57 = vector.extract_strided_slice %3 {offsets = [256, 0], sizes = [64, 1], strides = [1, 1]} : vector<320x1xf32> to vector<64x1xf32>
    %58 = vector.broadcast %57 : vector<64x1xf32> to vector<64x256xf32>
    %59 = arith.mulf %58, %56 : vector<64x256xf32>
    %cst_13 = arith.constant dense<0.000000e+00> : vector<256xf32>
    %60 = vector.multi_reduction <add>, %59, %cst_13 [0] : vector<64x256xf32> to vector<256xf32>
    %61 = vector.shape_cast %60 : vector<256xf32> to vector<1x256xf32>
    %62 = arith.addf %39, %61 : vector<1x256xf32>
    %c0_14 = arith.constant 0 : index
    %c0_15 = arith.constant 0 : index
    %63 = vector.load %arg7[%c0_14, %c0_15] : memref<1x256xf32, #tpu.memory_space<vmem>>, vector<1x256xf32>
    tpu.vector_store %arg7[%c0_14, %c0_15], %62 {strides = array<i32>} : memref<1x256xf32, #tpu.memory_space<vmem>>, vector<1x256xf32>,
    return
  }
  func.func @transform_0(%arg0: i32) -> (i32, i32) {
    %c0_i32 = arith.constant 0 : i32
    %c0_i32_0 = arith.constant 0 : i32
    return %c0_i32, %arg0 : i32, i32
  }
  func.func @transform_1(%arg0: i32) -> (i32, i32) {
    %c0_i32 = arith.constant 0 : i32
    %c0_i32_0 = arith.constant 0 : i32
    %c0_i32_1 = arith.constant 0 : i32
    return %c0_i32, %c0_i32_0 : i32, i32
  }
  func.func @transform_2(%arg0: i32) -> (i32, i32) {
    %c0_i32 = arith.constant 0 : i32
    %c0_i32_0 = arith.constant 0 : i32
    %c0_i32_1 = arith.constant 0 : i32
    return %c0_i32, %c0_i32_0 : i32, i32
  }
  func.func @transform_3(%arg0: i32) -> (i32, i32) {
    %c0_i32 = arith.constant 0 : i32
    %c0_i32_0 = arith.constant 0 : i32
    %c0_i32_1 = arith.constant 0 : i32
    return %c0_i32, %c0_i32_0 : i32, i32
  }
  func.func @transform_4(%arg0: i32) -> (i32, i32) {
    %c0_i32 = arith.constant 0 : i32
    %c0_i32_0 = arith.constant 0 : i32
    %c0_i32_1 = arith.constant 0 : i32
    return %c0_i32, %c0_i32_0 : i32, i32
  }
  func.func @transform_5(%arg0: i32) -> (i32, i32) {
    %c0_i32 = arith.constant 0 : i32
    %c0_i32_0 = arith.constant 0 : i32
    %c0_i32_1 = arith.constant 0 : i32
    return %c0_i32, %c0_i32_0 : i32, i32
  }
  func.func @transform_6(%arg0: i32) -> (i32, i32) {
    %c0_i32 = arith.constant 0 : i32
    %c0_i32_0 = arith.constant 0 : i32
    return %c0_i32, %arg0 : i32, i32
  }
}

</mosaic_0001>

<bundles_post_ra>
// kernel: model_forward.1
= control target key start
LH: loop header
LB: loop body
LE: loop exit
PB: predicated region body
PF: predicated region fallthrough
CT: control target
= control target key end

     0   :  { %s3376_s0 = inlined_call_operand.vmem [shape: f32[2,512], index: 0, kind: input, shape index: {}]   ;;  %s3377_s1 = inlined_call_operand.vmem [shape: f32[320,2], index: 1, kind: input, shape index: {}]   ;;  %s3378_s2 = inlined_call_operand.vmem [shape: f32[320,1], index: 2, kind: input, shape index: {}]   ;;  %s3379_s3 = inlined_call_operand.vmem [shape: f32[320,1], index: 3, kind: input, shape index: {}]   ;;  %s3380_s4 = inlined_call_operand.vmem [shape: f32[1,2], index: 4, kind: input, shape index: {}]   ;;  %s3381_s5 = inlined_call_operand.<no memory space> [shape: f32[1,1], index: 5, kind: input, shape index: {}]   ;;  %s3382_s6 = inlined_call_operand.hbm [shape: f32[1,512], index: 6, kind: output, shape index: {}]  }
   0x1   :  { %v11_v0 = vstv %s3381_s5 }
   0x2   :  { %12 = vst [vmem:[#allocation2] sm:$0x1] %v11_v0 }
   0x3   :  { %13 = vsyncpa [#allocation4], 0 }
   0x4   :  { %15 = vsyncpa [#allocation4 + $0x1], 0  ;;  %s2079_s23 = smov 0   ;;  %s2081_s24 = smov 0  }
   0x5   :  { %s2083_s25 = smov 0   ;;  %s2085_s26 = smov 0  }
   0x6 LB: > { %s2100_s5 = sadd.s32 4294967295, %s2034_s26   ;;  %s1901_s27 = sadd.s32 4294967294, %s2034_s26   ;;  %s2034_s26 = sphi %s2085_s26, %s3633_s26   ;;  %s2030_s25 = sphi %s2083_s25, %s3632_s25   ;;  %s2026_s24 = sphi %s2081_s24, %s3631_s24   ;;  %s2022_s23 = sphi %s2079_s23, %s3630_s23  }
   0x7   : > { %s2104_s28 = sadd.s32 1, %s2034_s26   ;;  %s159_s29 = sadd.s32 1, %s2030_s25 }
   0x8   : > { %s156_s30 = ssub.s32 %s2034_s26, %s2104_s28  ;;  %p169_p0 = scmp.ne.s32.totalorder %s2030_s25, %s2026_s24 }
   0x9   : > { %p157_p1 = scmp.eq.s32.totalorder %s156_s30, 0  ;;  %p170_p2 = scmp.eq.s32.totalorder %s2100_s5, 1 }
   0xa   : > { %p175_p3 = scmp.ne.s32.totalorder %s2026_s24, %s2022_s23  ;;  %p176_p4 = scmp.eq.s32.totalorder %s1901_s27, 1 }
   0xb   : > { %s2115_s7 = scalar_select %p157_p1, %s2030_s25, %s159_s29  }
   0xc   : > { %p2117_p5 = por %p170_p2, %p169_p0  ;;  %p2121_p6 = por %p176_p4, %p175_p3 }
   0xd   : > { %p1904_p7 = scmp.ge.s32.totalorder %s2034_s26, 1  ;;  %p218_p8 = scmp.lt.s32.totalorder %s2034_s26, 3 }
   0xf   : > { %p219_p9 = pnand %p1904_p7, %p218_p8 }
  0x11   : > { %222 = sbr.rel (%p219_p9) target bundleno = 541 (0x21d), region = 44 }
  0x18   : > { %v377_v1 = vld [vmem:[#allocation2] sm:$0x1]  ;;  %v3385_v3 = vmov 1   ;;  %v3383_v4 = vmov 0   ;;  %v257_v5 = vld [vmem:[%s3377_s1 + $0x8] sm:$0xff]  ;;  %v262_v8 = vld [vmem:[%s3377_s1 + $0x30] sm:$0xff] }
  0x19   : > { %v2130_v2 = vld [vmem:[%s3380_s4] sm:$0x1]  ;;  %1958 = vset.pattern.permute.xlu0 %v3385_v3  ;;  %1959 = vset.pattern.permute.xlu1 %v3383_v4  ;;  %v259_v9 = vld [vmem:[%s3377_s1 + $0x18] sm:$0xff]  ;;  %v266_v11 = vld [vmem:[%s3377_s1 + $0x50] sm:$0xff]  ;;  %s1906_s29 = sshll.u32 %s2100_s5, 1  ;;  %s1914_s20 = sshll.u32 %s2100_s5, 5 }
  0x1a   : > { %404 = vperm.xlu1 %1959, %v377_v1   ;;  %389 = vperm.xlu0 %1958, %v2130_v2   ;;  %v256_v6 = vld [vmem:[%s3377_s1] sm:$0xff]  ;;  %v270_v13 = vld [vmem:[%s3377_s1 + $0x70] sm:$0xff]  ;;  %v2195_v23 = vld [vmem:[%s3377_s1 + $0x118] sm:$0xff]  ;;  %p249_p10 = scmp.lt.s32.totalorder %s1906_s29, 3  ;;  %s3334_s10 = scalar_lea.hbm %s3382_s6, %s1914_s20 }
  0x1b   : > { %v260_v7 = vld [vmem:[%s3377_s1 + $0x20] sm:$0xff]  ;;  %v274_v15 = vld [vmem:[%s3377_s1 + $0x90] sm:$0xff]  ;;  %v261_v26 = vld [vmem:[%s3377_s1 + $0x28] sm:$0xff]  ;;  %s2040_s5 = smov [#allocation3]  }
  0x1c   : > { %v264_v10 = vld [vmem:[%s3377_s1 + $0x40] sm:$0xff]  ;;  %v278_v17 = vld [vmem:[%s3377_s1 + $0xb0] sm:$0xff]  ;;  %v263_v27 = vld [vmem:[%s3377_s1 + $0x38] sm:$0xff]  ;;  %s3635_s29 = smov (!%p249_p10, %s1906_s29), 3  ;;  %s1976_s13 = sshll.u32 %s2040_s5, 4  ;;  %s1977_s13 = int_to_ptr.vmem [resolvable:$false] %s1976_s13 }
  0x1d   : > { %v268_v12 = vld [vmem:[%s3377_s1 + $0x60] sm:$0xff]  ;;  %v282_v19 = vld [vmem:[%s3377_s1 + $0xd0] sm:$0xff]  ;;  %v265_v28 = vld [vmem:[%s3377_s1 + $0x48] sm:$0xff]  ;;  %s1907_s19 = sshll.u32 %s3635_s29, 1  ;;  %s1978_s14 = scalar_lea.vmem %s1977_s13, 64 }
  0x1e   : > { %660 = vperm.xlu0 %1958, %v257_v5   ;;  %414 = vperm.xlu1 %1959, %v256_v6   ;;  %v272_v14 = vld [vmem:[%s3377_s1 + $0x80] sm:$0xff]  ;;  %v286_v21 = vld [vmem:[%s3377_s1 + $0xf0] sm:$0xff]  ;;  %v267_v29 = vld [vmem:[%s3377_s1 + $0x58] sm:$0xff]  ;;  %s2599_s30 = scalar_lea.vmem %s3376_s0, %s1907_s19  ;;  %s245_s19 = sand.u32 1, %s2026_s24  }
  0x1f   : > { %v276_v16 = vld [vmem:[%s3377_s1 + $0xa0] sm:$0xff]  ;;  %v2201_v24 = vld [vmem:[%s3377_s1 + $0x130] sm:$0xff]  ;;  %v269_v30 = vld [vmem:[%s3377_s1 + $0x68] sm:$0xff]  ;;  %s1828_s11 = scalar_lea.sflag [#allocation4], %s245_s19 }
  0x20   : > { %v280_v18 = vld [vmem:[%s3377_s1 + $0xc0] sm:$0xff]  ;;  %3449 = vst [vmem:[#allocation6_spill] sm:$0xff] %v2201_v24  ;;  %v258_v25 = vld [vmem:[%s3377_s1 + $0x10] sm:$0xff]  ;;  %v271_v31 = vld [vmem:[%s3377_s1 + $0x78] sm:$0xff] }
  0x21   : > { %v284_v20 = vld [vmem:[%s3377_s1 + $0xe0] sm:$0xff]  ;;  %v273_v32 = vld [vmem:[%s3377_s1 + $0x88] sm:$0xff]  ;;  %v275_v33 = vld [vmem:[%s3377_s1 + $0x98] sm:$0xff] }
  0x22   : > { %672 = vperm.xlu0 %1958, %v260_v7   ;;  %419 = vperm.xlu1 %1959, %v257_v5   ;;  %v2189_v22 = vld [vmem:[%s3377_s1 + $0x100] sm:$0xff]  ;;  %v277_v34 = vld [vmem:[%s3377_s1 + $0xa8] sm:$0xff]  ;;  %v279_v35 = vld [vmem:[%s3377_s1 + $0xb8] sm:$0xff] }
  0x23   : > { %v281_v36 = vld [vmem:[%s3377_s1 + $0xc8] sm:$0xff]  ;;  %v283_v37 = vld [vmem:[%s3377_s1 + $0xd8] sm:$0xff]  ;;  %v296_v46 = vld [vmem:[%s3378_s2] sm:$0xff] }
  0x24   : > { %v285_v40 = vld [vmem:[%s3377_s1 + $0xe8] sm:$0xff]  ;;  %v287_v43 = vld [vmem:[%s3377_s1 + $0xf8] sm:$0xff]  ;;  %v298_v53 = vld [vmem:[%s3378_s2 + $0x10] sm:$0xff] }
  0x25   : > { %v297_v49 = vld [vmem:[%s3378_s2 + $0x8] sm:$0xff]  ;;  %v299_v50 = vld [vmem:[%s3378_s2 + $0x18] sm:$0xff]  ;;  %v300_v57 = vld [vmem:[%s3378_s2 + $0x20] sm:$0xff] }
  0x26   : > { %680 = vperm.xlu0 %1958, %v262_v8   ;;  %429 = vperm.xlu1 %1959, %v259_v9   ;;  %v301_v54 = vld [vmem:[%s3378_s2 + $0x28] sm:$0xff]  ;;  %v303_v58 = vld [vmem:[%s3378_s2 + $0x38] sm:$0xff]  ;;  %v302_v61 = vld [vmem:[%s3378_s2 + $0x30] sm:$0xff] }
  0x27   : > { %v305_v62 = vld [vmem:[%s3378_s2 + $0x48] sm:$0xff]  ;;  %v304_v1 = vld [vmem:[%s3378_s2 + $0x40] sm:$0xff] }
  0x2a   : > { %688 = vperm.xlu0 %1958, %v264_v10   ;;  %434 = vperm.xlu1 %1959, %v260_v7   ;;  %v306_v7 = vld [vmem:[%s3378_s2 + $0x50] sm:$0xff] }
  0x2e   : > { %696 = vperm.xlu0 %1958, %v266_v11   ;;  %444 = vperm.xlu1 %1959, %v262_v8   ;;  %v309_v8 = vld [vmem:[%s3378_s2 + $0x68] sm:$0xff] }
  0x32   : > { %704 = vperm.xlu0 %1958, %v268_v12   ;;  %454 = vperm.xlu1 %1959, %v264_v10  }
  0x36   : > { %712 = vperm.xlu0 %1958, %v270_v13   ;;  %464 = vperm.xlu1 %1959, %v266_v11   ;;  %v308_v11 = vld [vmem:[%s3378_s2 + $0x60] sm:$0xff] }
  0x3a   : > { %720 = vperm.xlu0 %1958, %v272_v14   ;;  %474 = vperm.xlu1 %1959, %v268_v12   ;;  %v311_v12 = vld [vmem:[%s3378_s2 + $0x78] sm:$0xff] }
  0x3e   : > { %728 = vperm.xlu0 %1958, %v274_v15   ;;  %484 = vperm.xlu1 %1959, %v270_v13  }
  0x42   : > { %736 = vperm.xlu0 %1958, %v276_v16   ;;  %494 = vperm.xlu1 %1959, %v272_v14  }
  0x46   : > { %744 = vperm.xlu0 %1958, %v278_v17   ;;  %504 = vperm.xlu1 %1959, %v274_v15   ;;  %v310_v15 = vld [vmem:[%s3378_s2 + $0x70] sm:$0xff] }
  0x4a   : > { %752 = vperm.xlu0 %1958, %v280_v18   ;;  %514 = vperm.xlu1 %1959, %v276_v16   ;;  %v313_v16 = vld [vmem:[%s3378_s2 + $0x88] sm:$0xff] }
  0x4e   : > { %760 = vperm.xlu0 %1958, %v282_v19   ;;  %524 = vperm.xlu1 %1959, %v278_v17  }
  0x52   : > { %768 = vperm.xlu0 %1958, %v284_v20   ;;  %534 = vperm.xlu1 %1959, %v280_v18  }
  0x56   : > { %776 = vperm.xlu0 %1958, %v286_v21   ;;  %544 = vperm.xlu1 %1959, %v282_v19   ;;  %v312_v19 = vld [vmem:[%s3378_s2 + $0x80] sm:$0xff] }
  0x5a   : > { %1584 = vperm.xlu0 %1958, %v2189_v22   ;;  %554 = vperm.xlu1 %1959, %v284_v20   ;;  %v315_v20 = vld [vmem:[%s3378_s2 + $0x98] sm:$0xff] }
  0x5e   : > { %1596 = vperm.xlu0 %1958, %v2195_v23   ;;  %564 = vperm.xlu1 %1959, %v286_v21  }
  0x62   : > { %1608 = vperm.xlu0 %1958, %v2201_v24   ;;  %1960 = vset.pattern.permute.xlu1 %v3385_v3  ;;  %v355_v3 = vld [vmem:[%s3379_s3 + $0x98] sm:$0xff] }
  0x63   : > { %656 = vperm.xlu1 %1960, %v256_v6  }
  0x66   : > { %1968 = vset.pattern.permute.xlu0 %v3383_v4 }
  0x67   : > { %380 = vperm.xlu0 %1968, %v2130_v2   ;;  %664 = vperm.xlu1 %1960, %v258_v25   ;;  %v307_v2 = vld [vmem:[%s3378_s2 + $0x58] sm:$0xff] }
  0x6b   : > { %424 = vperm.xlu0 %1968, %v258_v25   ;;  %668 = vperm.xlu1 %1960, %v259_v9  }
  0x6f   : > { %439 = vperm.xlu0 %1968, %v261_v26   ;;  %676 = vperm.xlu1 %1960, %v261_v26   ;;  %v314_v26 = vld [vmem:[%s3378_s2 + $0x90] sm:$0xff] }
  0x73   : > { %449 = vperm.xlu0 %1968, %v263_v27   ;;  %684 = vperm.xlu1 %1960, %v263_v27   ;;  %v317_v27 = vld [vmem:[%s3378_s2 + $0xa8] sm:$0xff] }
  0x77   : > { %459 = vperm.xlu0 %1968, %v265_v28   ;;  %692 = vperm.xlu1 %1960, %v265_v28  }
  0x7b   : > { %469 = vperm.xlu0 %1968, %v267_v29   ;;  %700 = vperm.xlu1 %1960, %v267_v29  }
  0x7f   : > { %479 = vperm.xlu0 %1968, %v269_v30   ;;  %708 = vperm.xlu1 %1960, %v269_v30   ;;  %v316_v30 = vld [vmem:[%s3378_s2 + $0xa0] sm:$0xff] }
  0x83   : > { %489 = vperm.xlu0 %1968, %v271_v31   ;;  %716 = vperm.xlu1 %1960, %v271_v31   ;;  %v319_v31 = vld [vmem:[%s3378_s2 + $0xb8] sm:$0xff] }
  0x87   : > { %499 = vperm.xlu0 %1968, %v273_v32   ;;  %724 = vperm.xlu1 %1960, %v273_v32  }
  0x8b   : > { %509 = vperm.xlu0 %1968, %v275_v33   ;;  %732 = vperm.xlu1 %1960, %v275_v33  }
  0x8f   : > { %519 = vperm.xlu0 %1968, %v277_v34   ;;  %740 = vperm.xlu1 %1960, %v277_v34   ;;  %v318_v34 = vld [vmem:[%s3378_s2 + $0xb0] sm:$0xff] }
  0x93   : > { %529 = vperm.xlu0 %1968, %v279_v35   ;;  %748 = vperm.xlu1 %1960, %v279_v35   ;;  %v321_v35 = vld [vmem:[%s3378_s2 + $0xc8] sm:$0xff] }
  0x97   : > { %539 = vperm.xlu0 %1968, %v281_v36   ;;  %756 = vperm.xlu1 %1960, %v281_v36  }
  0x99   : > { %v2246_v38 = vpop.permute.xlu1 %404  ;;  %v2248_v39 = vpop.permute.xlu0 %389 }
  0x9a   : > { %3450 = vst [vmem:[#allocation7_spill] sm:$0xff] %v2246_v38  ;;  %3451 = vst [vmem:[#allocation8_spill] sm:$0xff] %v2248_v39 }
  0x9b   : > { %549 = vperm.xlu0 %1968, %v283_v37   ;;  %764 = vperm.xlu1 %1960, %v283_v37  }
  0x9d   : > { %v2253_v41 = vpop.permute.xlu0 %660  ;;  %v2255_v42 = vpop.permute.xlu1 %414 }
  0x9f   : > { %559 = vperm.xlu0 %1968, %v285_v40   ;;  %772 = vperm.xlu1 %1960, %v285_v40   ;;  %v320_v40 = vld [vmem:[%s3378_s2 + $0xc0] sm:$0xff] }
  0xa1   : > { %v2260_v44 = vpop.permute.xlu0 %672  ;;  %v2262_v45 = vpop.permute.xlu1 %419 }
  0xa3   : > { %569 = vperm.xlu0 %1968, %v287_v43   ;;  %780 = vperm.xlu1 %1960, %v287_v43   ;;  %v323_v43 = vld [vmem:[%s3378_s2 + $0xd8] sm:$0xff] }
  0xa5   : > { %v2267_v47 = vpop.permute.xlu0 %680  ;;  %v2269_v48 = vpop.permute.xlu1 %429 }
  0xa7   : > { %931 = vperm.xlu0 %1968, %v296_v46   ;;  %1961 = vset.pattern.permute.xlu1 %v3383_v4 }
  0xa8   : > { %936 = vperm.xlu1 %1961, %v297_v49  }
  0xa9   : > { %v2278_v51 = vpop.permute.xlu0 %688  ;;  %v2280_v52 = vpop.permute.xlu1 %434 }
  0xab   : > { %946 = vperm.xlu0 %1968, %v299_v50   ;;  %v322_v50 = vld [vmem:[%s3378_s2 + $0xd0] sm:$0xff] }
  0xac   : > { %941 = vperm.xlu1 %1961, %v298_v53   ;;  %v325_v53 = vld [vmem:[%s3378_s2 + $0xe8] sm:$0xff] }
  0xad   : > { %v2288_v55 = vpop.permute.xlu0 %696  ;;  %v2290_v56 = vpop.permute.xlu1 %444 }
  0xaf   : > { %956 = vperm.xlu0 %1968, %v301_v54  }
  0xb0   : > { %951 = vperm.xlu1 %1961, %v300_v57  }
  0xb1   : > { %v2298_v59 = vpop.permute.xlu0 %704  ;;  %v2300_v60 = vpop.permute.xlu1 %454 }
  0xb3   : > { %966 = vperm.xlu0 %1968, %v303_v58   ;;  %v324_v58 = vld [vmem:[%s3378_s2 + $0xe0] sm:$0xff] }
  0xb4   : > { %961 = vperm.xlu1 %1961, %v302_v61   ;;  %v327_v61 = vld [vmem:[%s3378_s2 + $0xf8] sm:$0xff] }
  0xb5   : > { %v2308_v63 = vpop.permute.xlu0 %712  ;;  %v2310_v0 = vpop.permute.xlu1 %464 }
  0xb7   : > { %976 = vperm.xlu0 %1968, %v305_v62  }
  0xb8   : > { %971 = vperm.xlu1 %1961, %v304_v1   ;;  %v326_v1 = vld [vmem:[%s3378_s2 + $0xf0] sm:$0xff] }
  0xb9   : > { %v2318_v5 = vpop.permute.xlu0 %720  ;;  %v2320_v6 = vpop.permute.xlu1 %474 }
  0xbb   : > { %986 = vperm.xlu0 %1968, %v307_v2  }
  0xbc   : > { %981 = vperm.xlu1 %1961, %v306_v7   ;;  %v337_v7 = vld [vmem:[%s3379_s3 + $0x8] sm:$0xff] }
  0xbd   : > { %v2328_v9 = vpop.permute.xlu0 %728  ;;  %v2330_v10 = vpop.permute.xlu1 %484 }
  0xbf   : > { %996 = vperm.xlu0 %1968, %v309_v8   ;;  %v336_v8 = vld [vmem:[%s3379_s3] sm:$0xff] }
  0xc0   : > { %991 = vperm.xlu1 %1961, %v308_v11  }
  0xc1   : > { %v2338_v13 = vpop.permute.xlu0 %736  ;;  %v2340_v14 = vpop.permute.xlu1 %494 }
  0xc3   : > { %1006 = vperm.xlu0 %1968, %v311_v12  }
  0xc4   : > { %1001 = vperm.xlu1 %1961, %v310_v15   ;;  %v339_v15 = vld [vmem:[%s3379_s3 + $0x18] sm:$0xff] }
  0xc5   : > { %v2348_v17 = vpop.permute.xlu0 %744  ;;  %v2350_v18 = vpop.permute.xlu1 %504 }
  0xc7   : > { %1016 = vperm.xlu0 %1968, %v313_v16   ;;  %v338_v16 = vld [vmem:[%s3379_s3 + $0x10] sm:$0xff] }
  0xc8   : > { %1011 = vperm.xlu1 %1961, %v312_v19  }
  0xc9   : > { %v2358_v21 = vpop.permute.xlu0 %752  ;;  %v2360_v25 = vpop.permute.xlu1 %514 }
  0xcb   : > { %1026 = vperm.xlu0 %1968, %v315_v20  }
  0xcc   : > { %1021 = vperm.xlu1 %1961, %v314_v26   ;;  %v341_v26 = vld [vmem:[%s3379_s3 + $0x28] sm:$0xff] }
  0xcd   : > { %v2368_v28 = vpop.permute.xlu0 %760  ;;  %v2370_v29 = vpop.permute.xlu1 %524 }
  0xcf   : > { %1036 = vperm.xlu0 %1968, %v317_v27   ;;  %v340_v27 = vld [vmem:[%s3379_s3 + $0x20] sm:$0xff] }
  0xd0   : > { %1031 = vperm.xlu1 %1961, %v316_v30  }
  0xd1   : > { %v2378_v32 = vpop.permute.xlu0 %768  ;;  %v2380_v33 = vpop.permute.xlu1 %534 }
  0xd3   : > { %1046 = vperm.xlu0 %1968, %v319_v31  }
  0xd4   : > { %1041 = vperm.xlu1 %1961, %v318_v34   ;;  %v343_v34 = vld [vmem:[%s3379_s3 + $0x38] sm:$0xff] }
  0xd5   : > { %v2388_v36 = vpop.permute.xlu0 %776  ;;  %v2390_v37 = vpop.permute.xlu1 %544 }
  0xd7   : > { %1056 = vperm.xlu0 %1968, %v321_v35   ;;  %v342_v35 = vld [vmem:[%s3379_s3 + $0x30] sm:$0xff] }
  0xd8   : > { %1051 = vperm.xlu1 %1961, %v320_v40  }
  0xd9   : > { %v2398_v46 = vpop.permute.xlu0 %1584  ;;  %v2400_v49 = vpop.permute.xlu1 %554 }
  0xda   : > { %3452 = vst [vmem:[#allocation9_spill] sm:$0xff] %v2398_v46  ;;  %3453 = vst [vmem:[#allocation10_spill] sm:$0xff] %v2400_v49  ;;  %v361_v46 = vld [vmem:[%s3379_s3 + $0xc8] sm:$0xff]  ;;  %v363_v49 = vld [vmem:[%s3379_s3 + $0xd8] sm:$0xff] }
  0xdb   : > { %1066 = vperm.xlu0 %1968, %v323_v43  }
  0xdc   : > { %1061 = vperm.xlu1 %1961, %v322_v50   ;;  %v345_v50 = vld [vmem:[%s3379_s3 + $0x48] sm:$0xff] }
  0xdd   : > { %v2408_v54 = vpop.permute.xlu0 %1596  ;;  %v2410_v57 = vpop.permute.xlu1 %564 }
  0xde   : > { %3454 = vst [vmem:[#allocation11_spill] sm:$0xff] %v2408_v54  ;;  %3455 = vst [vmem:[#allocation12_spill] sm:$0xff] %v2410_v57 }
  0xdf   : > { %1076 = vperm.xlu0 %1968, %v325_v53   ;;  %v344_v53 = vld [vmem:[%s3379_s3 + $0x40] sm:$0xff] }
  0xe0   : > { %1071 = vperm.xlu1 %1961, %v324_v58  }
  0xe1   : > { %v2418_v62 = vpop.permute.xlu0 %1608 }
  0xe2   : > { %3456 = vst [vmem:[#allocation13_spill] sm:$0xff] %v2418_v62  ;;  %v2423_v2 = vpop.permute.xlu1 %656 }
  0xe3   : > { %1086 = vperm.xlu0 %1968, %v327_v61  }
  0xe4   : > { %1081 = vperm.xlu1 %1961, %v326_v1   ;;  %v347_v1 = vld [vmem:[%s3379_s3 + $0x58] sm:$0xff] }
  0xe6   : > { %v2431_v11 = vpop.permute.xlu0 %380  ;;  %v2433_v12 = vpop.permute.xlu1 %664 }
  0xe7   : > { %3457 = vst [vmem:[#allocation14_spill] sm:$0xff] %v2431_v11  ;;  %1224 = vperm.xlu0 %1968, %v337_v7   ;;  %v346_v7 = vld [vmem:[%s3379_s3 + $0x50] sm:$0xff]  ;;  %v357_v11 = vld [vmem:[%s3379_s3 + $0xa8] sm:$0xff] }
  0xe8   : > { %1219 = vperm.xlu1 %1961, %v336_v8  }
  0xea   : > { %v2441_v19 = vpop.permute.xlu0 %424  ;;  %v2443_v20 = vpop.permute.xlu1 %668 }
  0xeb   : > { %1234 = vperm.xlu0 %1968, %v339_v15  }
  0xec   : > { %1229 = vperm.xlu1 %1961, %v338_v16   ;;  %v349_v16 = vld [vmem:[%s3379_s3 + $0x68] sm:$0xff] }
  0xee   : > { %v2451_v30 = vpop.permute.xlu0 %439  ;;  %v2453_v31 = vpop.permute.xlu1 %676 }
  0xef   : > { %1244 = vperm.xlu0 %1968, %v341_v26   ;;  %v348_v26 = vld [vmem:[%s3379_s3 + $0x60] sm:$0xff] }
  0xf0   : > { %1239 = vperm.xlu1 %1961, %v340_v27  }
  0xf2   : > { %v2461_v40 = vpop.permute.xlu0 %449  ;;  %v2463_v43 = vpop.permute.xlu1 %684 }
  0xf3   : > { %3458 = vst [vmem:[#allocation15_spill] sm:$0xff] %v2461_v40  ;;  %3459 = vst [vmem:[#allocation16_spill] sm:$0xff] %v2463_v43  ;;  %1254 = vperm.xlu0 %1968, %v343_v34  }
  0xf4   : > { %1249 = vperm.xlu1 %1961, %v342_v35   ;;  %v351_v35 = vld [vmem:[%s3379_s3 + $0x78] sm:$0xff] }
  0xf6   : > { %v2471_v58 = vpop.permute.xlu0 %459  ;;  %v2473_v61 = vpop.permute.xlu1 %692 }
  0xf7   : > { %3460 = vst [vmem:[#allocation17_spill] sm:$0xff] %v2471_v58  ;;  %3461 = vst [vmem:[#allocation18_spill] sm:$0xff] %v2473_v61  ;;  %1264 = vperm.xlu0 %1968, %v345_v50   ;;  %v350_v50 = vld [vmem:[%s3379_s3 + $0x70] sm:$0xff] }
  0xf8   : > { %1259 = vperm.xlu1 %1961, %v344_v53  }
  0xfa   : > { %v2481_v8 = vpop.permute.xlu0 %469  ;;  %v2483_v15 = vpop.permute.xlu1 %700 }
  0xfb   : > { %3462 = vst [vmem:[#allocation19_spill] sm:$0xff] %v2481_v8  ;;  %3463 = vst [vmem:[#allocation20_spill] sm:$0xff] %v2483_v15  ;;  %1274 = vperm.xlu0 %1968, %v347_v1  }
  0xfc   : > { %1269 = vperm.xlu1 %1961, %v346_v7   ;;  %v353_v7 = vld [vmem:[%s3379_s3 + $0x88] sm:$0xff] }
  0xfe   : > { %v2491_v27 = vpop.permute.xlu0 %479  ;;  %v2493_v34 = vpop.permute.xlu1 %708 }
  0xff   : > { %3464 = vst [vmem:[#allocation21_spill] sm:$0xff] %v2491_v27  ;;  %3465 = vst [vmem:[#allocation22_spill] sm:$0xff] %v2493_v34  ;;  %1284 = vperm.xlu0 %1968, %v349_v16   ;;  %v352_v16 = vld [vmem:[%s3379_s3 + $0x80] sm:$0xff] }
 0x100   : > { %1279 = vperm.xlu1 %1961, %v348_v26  }
 0x102   : > { %v2501_v53 = vpop.permute.xlu0 %489  ;;  %v2503_v1 = vpop.permute.xlu1 %716 }
 0x103   : > { %3466 = vst [vmem:[#allocation23_spill] sm:$0xff] %v2501_v53  ;;  %3467 = vst [vmem:[#allocation24_spill] sm:$0xff] %v2503_v1  ;;  %1294 = vperm.xlu0 %1968, %v351_v35   ;;  %v354_v35 = vld [vmem:[%s3379_s3 + $0x90] sm:$0xff] }
 0x104   : > { %1289 = vperm.xlu1 %1961, %v350_v50  }
 0x106   : > { %v2511_v26 = vpop.permute.xlu0 %499  ;;  %v2513_v4 = vpop.permute.xlu1 %724 }
 0x107   : > { %3468 = vst [vmem:[#allocation25_spill] sm:$0xff] %v2511_v26  ;;  %3469 = vst [vmem:[#allocation26_spill] sm:$0xff] %v2513_v4  ;;  %1304 = vperm.xlu0 %1968, %v353_v7   ;;  %v356_v7 = vld [vmem:[%s3379_s3 + $0xa0] sm:$0xff]  ;;  %v366_v26 = vld [vmem:[%s3379_s3 + $0xf0] sm:$0xff] }
 0x108   : > { %1299 = vperm.xlu1 %1961, %v352_v16  }
 0x10a   : > { %v2521_v50 = vpop.permute.xlu0 %509  ;;  %v2523_v38 = vpop.permute.xlu1 %732 }
 0x10b   : > { %3470 = vst [vmem:[#allocation27_spill] sm:$0xff] %v2521_v50  ;;  %3471 = vst [vmem:[#allocation28_spill] sm:$0xff] %v2523_v38  ;;  %1314 = vperm.xlu0 %1968, %v355_v3   ;;  %v359_v3 = vld [vmem:[%s3379_s3 + $0xb8] sm:$0xff] }
 0x10c   : > { %1309 = vperm.xlu1 %1961, %v354_v35   ;;  %v358_v35 = vld [vmem:[%s3379_s3 + $0xb0] sm:$0xff] }
 0x10e   : > { %v2531_v16 = vpop.permute.xlu0 %519  ;;  %v2533_v39 = vpop.permute.xlu1 %740 }
 0x10f   : > { %1324 = vperm.xlu0 %1968, %v357_v11   ;;  %v360_v11 = vld [vmem:[%s3379_s3 + $0xc0] sm:$0xff] }
 0x110   : > { %1319 = vperm.xlu1 %1961, %v356_v7  }
 0x112   : > { %v2541_v62 = vpop.permute.xlu0 %529  ;;  %v2543_v54 = vpop.permute.xlu1 %748 }
 0x113   : > { %1334 = vperm.xlu0 %1968, %v359_v3   ;;  %v362_v3 = vld [vmem:[%s3379_s3 + $0xd0] sm:$0xff] }
 0x114   : > { %1329 = vperm.xlu1 %1961, %v358_v35  }
 0x116   : > { %v2551_v7 = vpop.permute.xlu0 %539  ;;  %v2553_v57 = vpop.permute.xlu1 %756 }
 0x117   : > { %1344 = vperm.xlu0 %1968, %v361_v46   ;;  %v365_v46 = vld [vmem:[%s3379_s3 + $0xe8] sm:$0xff] }
 0x118   : > { %1339 = vperm.xlu1 %1961, %v360_v11   ;;  %v364_v11 = vld [vmem:[%s3379_s3 + $0xe0] sm:$0xff] }
 0x11a   : > { %v2562_v35 = vpop.permute.xlu0 %549  ;;  %v2564_v38 = vpop.permute.xlu1 %764 }
 0x11b   : > { %3472 = vst [vmem:[#allocation29_spill] sm:$0xff] %v2562_v35  ;;  %3473 = vst [vmem:[#allocation30_spill] sm:$0xff] %v2564_v38  ;;  %1354 = vperm.xlu0 %1968, %v363_v49   ;;  %v367_v49 = vld [vmem:[%s3379_s3 + $0xf8] sm:$0xff] }
 0x11c   : > { %1349 = vperm.xlu1 %1961, %v362_v3   ;;  %v3401_v3 = vlaneseq }
 0x11e   : > { %v2572_v50 = vpop.permute.xlu0 %559  ;;  %v2574_v4 = vpop.permute.xlu1 %772 }
 0x11f   : > { %3474 = vst [vmem:[#allocation31_spill] sm:$0xff] %v2572_v50  ;;  %3475 = vst [vmem:[#allocation32_spill] sm:$0xff] %v2574_v4  ;;  %1364 = vperm.xlu0 %1968, %v365_v46   ;;  %v289_v46 = vld [vmem:[%s3377_s1 + $0x108] sm:$0xff]  ;;  %v2624_v50 = vld [vmem:[%s3377_s1 + $0x120] sm:$0xff] }
 0x120   : > { %1359 = vperm.xlu1 %1961, %v364_v11   ;;  %v2590_v11 = vshrl.u32 %v3401_v3, 7 }
 0x122   : > { %v2582_v1 = vpop.permute.xlu0 %569  ;;  %v2584_v53 = vpop.permute.xlu1 %780  ;;  %3478 = vst [vmem:[#allocation35_spill] sm:$0xff] %v2590_v11  ;;  %v785_v27 = vsub.s32 1, %v2590_v11  ;;  %v789_v15 = vsub.s32 3, %v2590_v11  ;;  %v579_v3 = vsub.s32 2, %v2590_v11 }
 0x123   : > { %3476 = vst [vmem:[#allocation33_spill] sm:$0xff] %v2582_v1  ;;  %3477 = vst [vmem:[#allocation34_spill] sm:$0xff] %v2584_v53  ;;  %1374 = vperm.xlu0 %1968, %v367_v49   ;;  %v2605_v49 = vsub.s32 0, %v2590_v11  ;;  %v255_v53 = vld [vmem:[%s2599_s30] sm:$0xf] }
 0x124   : > { %1369 = vperm.xlu1 %1961, %v366_v26   ;;  %v786_v8 = vrot.slane %v255_v53, %v785_v27  ;;  %v790_v61 = vrot.slane %v255_v53, %v789_v15 }
 0x125   : > { %3481 = vst [vmem:[#allocation38_spill] sm:$0xff] %v2605_v49  ;;  %v576_v11 = vrot.slane %v255_v53, %v2605_v49 }
 0x126   : > { %v2592_v34 = vpop.permute.xlu0 %931  ;;  %v2628_v15 = vrot.slane %v786_v8, %v785_v27 }
 0x127   : > { %3479 = vst [vmem:[#allocation36_spill] sm:$0xff] %v2592_v34  ;;  %1534 = vperm.xlu0 %1968, %v289_v46   ;;  %v2601_v26 = vpop.permute.xlu1 %936  ;;  %v290_v34 = vld [vmem:[%s3377_s1 + $0x110] sm:$0xff] }
 0x128   : > { %3480 = vst [vmem:[#allocation37_spill] sm:$0xff] %v2601_v26  ;;  %1529 = vperm.xlu1 %1961, %v2189_v22   ;;  %v329_v22 = vld [vmem:[%s3378_s2 + $0x108] sm:$0xff]  ;;  %v580_v26 = vrot.slane %v255_v53, %v579_v3  ;;  %3485 = vst [vmem:[#allocation42_spill] sm:$0xff] %v2628_v15  ;;  %v2641_v3 = vrot.slane %v576_v11, %v2605_v49 }
 0x129   : > { %v2638_v53 = vld [vmem:[%s3377_s1 + $0x128] sm:$0xff] }
 0x12a   : > { %v2612_v1 = vpop.permute.xlu0 %946  ;;  %v2644_v58 = vrot.slane %v580_v26, %v2605_v49  ;;  %v3491_v26 = vmov 1   ;;  %v331_v49 = vld [vmem:[%s3378_s2 + $0x118] sm:$0xff]  ;;  %v2675_v24 = vmul.f32 %v2641_v3, %v2255_v42  ;;  %v603_v38 = vmul.f32 %v2641_v3, %v2290_v56 }
 0x12b   : > { %3482 = vst [vmem:[#allocation39_spill] sm:$0xff] %v2612_v1  ;;  %1544 = vperm.xlu0 %1968, %v2195_v23   ;;  %v2615_v4 = vpop.permute.xlu1 %941  ;;  %v2630_v23 = vrot.slane %v790_v61, %v785_v27  ;;  %v803_v61 = vmul.f32 %v2628_v15, %v2253_v41 }
 0x12c   : > { %3483 = vst [vmem:[#allocation40_spill] sm:$0xff] %v2615_v4  ;;  %1539 = vperm.xlu1 %1961, %v290_v34   ;;  %3488 = vst [vmem:[#allocation45_spill] sm:$0xff] %v2644_v58  ;;  %v612_v35 = vmul.f32 %v2644_v58, %v2310_v0 }
 0x12d   : > { %3486 = vst [vmem:[#allocation43_spill] sm:$0xff] %v2630_v23  ;;  %v804_v27 = vmul.f32 %v2630_v23, %v2253_v41  ;;  %v809_v41 = vmul.f32 %v2628_v15, %v2260_v44 }
 0x12e   : > { %v2626_v1 = vpop.permute.xlu0 %956 }
 0x12f   : > { %3484 = vst [vmem:[#allocation41_spill] sm:$0xff] %v2626_v1  ;;  %1654 = vperm.xlu0 %1968, %v329_v22   ;;  %v2632_v4 = vpop.permute.xlu1 %951  ;;  %v593_v22 = vmul.f32 %v2641_v3, %v2262_v45  ;;  %v594_v1 = vmul.f32 %v2644_v58, %v2262_v45  ;;  %v599_v45 = vmul.f32 %v2641_v3, %v2280_v52 }
 0x130   : > { %3487 = vst [vmem:[#allocation44_spill] sm:$0xff] %v2632_v4  ;;  %1549 = vperm.xlu1 %1961, %v2624_v50   ;;  %v600_v4 = vmul.f32 %v2644_v58, %v2280_v52  ;;  %v813_v52 = vmul.f32 %v2628_v15, %v2267_v47 }
 0x131   : > { %v2681_v43 = vadd.f32 %v803_v61, %v593_v22  ;;  %v2683_v40 = vadd.f32 %v804_v27, %v594_v1  ;;  %v369_v1 = vld [vmem:[%s3379_s3 + $0x108] sm:$0xff]  ;;  %v818_v61 = vmul.f32 %v2630_v23, %v2278_v51  ;;  %v607_v27 = vmul.f32 %v2641_v3, %v2300_v60 }
 0x132   : > { %v2646_v8 = vpop.permute.xlu0 %966  ;;  %v2712_v22 = vmul.f32 %v2644_v58, %v2269_v48 }
 0x133   : > { %3489 = vst [vmem:[#allocation46_spill] sm:$0xff] %v2646_v8  ;;  %1554 = vperm.xlu0 %1968, %v2638_v53   ;;  %v2657_v11 = vpop.permute.xlu1 %961  ;;  %v810_v8 = vmul.f32 %v2630_v23, %v2260_v44  ;;  %3493 = vst [vmem:[#allocation49_spill] sm:$0xff] %v2681_v43  ;;  %v821_v43 = vmul.f32 %v2628_v15, %v2288_v55 }
 0x134   : > { %3490 = vst [vmem:[#allocation47_spill] sm:$0xff] %v2657_v11  ;;  %1962 = vset.pattern.permute.xlu1 %v3491_v26  ;;  %3494 = vst [vmem:[#allocation50_spill] sm:$0xff] %v2683_v40 }
 0x135   : > { %1588 = vperm.xlu1 %1962, %v289_v46   ;;  %v2679_v46 = vmul.f32 %v2644_v58, %v2255_v42  ;;  %v604_v42 = vmul.f32 %v2644_v58, %v2290_v56  ;;  %v2708_v56 = vmul.f32 %v2641_v3, %v2269_v48  ;;  %v2716_v40 = vadd.f32 %v810_v8, %v600_v4  ;;  %v328_v4 = vld [vmem:[%s3378_s2 + $0x100] sm:$0xff] }
 0x136   : > { %v2671_v11 = vpop.permute.xlu0 %976  ;;  %v825_v8 = vmul.f32 %v2628_v15, %v2298_v59 }
 0x137   : > { %3492 = vst [vmem:[#allocation48_spill] sm:$0xff] %v2671_v11  ;;  %1664 = vperm.xlu0 %1968, %v331_v49   ;;  %v2685_v44 = vpop.permute.xlu1 %971  ;;  %v814_v11 = vmul.f32 %v2630_v23, %v2267_v47  ;;  %v817_v49 = vmul.f32 %v2628_v15, %v2278_v51  ;;  %v608_v47 = vmul.f32 %v2644_v58, %v2300_v60  ;;  %3497 = vst [vmem:[#allocation53_spill] sm:$0xff] %v2716_v40 }
 0x138   : > { %3495 = vst [vmem:[#allocation51_spill] sm:$0xff] %v2685_v44  ;;  %v2714_v44 = vadd.f32 %v809_v41, %v599_v45  ;;  %v822_v60 = vmul.f32 %v2630_v23, %v2288_v55  ;;  %v615_v41 = vmul.f32 %v2641_v3, %v2320_v6  ;;  %v2737_v55 = vadd.f32 %v813_v52, %v603_v38 }
 0x139   : > { %1592 = vperm.xlu1 %1962, %v290_v34   ;;  %v611_v34 = vmul.f32 %v2641_v3, %v2310_v0  ;;  %v2739_v45 = vadd.f32 %v814_v11, %v604_v42  ;;  %v2744_v0 = vld [vmem:[%s3377_s1 + $0x138] sm:$0xff]  ;;  %v2752_v40 = vadd.f32 %v818_v61, %v608_v47  ;;  %v829_v38 = vmul.f32 %v2628_v15, %v2308_v63 }
 0x13a   : > { %3496 = vst [vmem:[#allocation52_spill] sm:$0xff] %v2714_v44  ;;  %v2718_v51 = vpop.permute.xlu0 %986  ;;  %v3500_v44 = vmov 0   ;;  %v830_v11 = vmul.f32 %v2630_v23, %v2308_v63  ;;  %v619_v52 = vmul.f32 %v2641_v3, %v2330_v10  ;;  %v624_v47 = vmul.f32 %v2644_v58, %v2340_v14 }
 0x13b   : > { %3498 = vst [vmem:[#allocation54_spill] sm:$0xff] %v2718_v51  ;;  %1726 = vperm.xlu0 %1968, %v369_v1   ;;  %v2728_v48 = vpop.permute.xlu1 %981  ;;  %v826_v1 = vmul.f32 %v2630_v23, %v2298_v59  ;;  %v616_v51 = vmul.f32 %v2644_v58, %v2320_v6  ;;  %v620_v59 = vmul.f32 %v2644_v58, %v2330_v10 }
 0x13c   : > { %3499 = vst [vmem:[#allocation55_spill] sm:$0xff] %v2728_v48  ;;  %v2750_v48 = vadd.f32 %v817_v49, %v607_v27  ;;  %v833_v6 = vmul.f32 %v2628_v15, %v2318_v5  ;;  %v623_v49 = vmul.f32 %v2641_v3, %v2340_v14  ;;  %v2769_v61 = vadd.f32 %v821_v43, %v611_v34  ;;  %v371_v43 = vld [vmem:[%s3379_s3 + $0x118] sm:$0xff] }
 0x13d   : > { %1963 = vset.pattern.permute.xlu1 %v3500_v44  ;;  %v2771_v27 = vadd.f32 %v822_v60, %v612_v35  ;;  %v834_v10 = vmul.f32 %v2630_v23, %v2318_v5  ;;  %v837_v35 = vmul.f32 %v2628_v15, %v2328_v9  ;;  %v838_v60 = vmul.f32 %v2630_v23, %v2328_v9 }
 0x13e   : > { %v2763_v42 = vpop.permute.xlu0 %996  ;;  %1649 = vperm.xlu1 %1963, %v328_v4   ;;  %v627_v4 = vmul.f32 %v2641_v3, %v2350_v18  ;;  %v628_v5 = vmul.f32 %v2644_v58, %v2350_v18  ;;  %v2793_v34 = vadd.f32 %v826_v1, %v616_v51  ;;  %v841_v14 = vmul.f32 %v2628_v15, %v2338_v13 }
 0x13f   : > { %3501 = vst [vmem:[#allocation56_spill] sm:$0xff] %v2763_v42  ;;  %1564 = vperm.xlu0 %1968, %v2744_v0   ;;  %v2774_v63 = vpop.permute.xlu1 %991  ;;  %v2782_v42 = vadd.f32 %v825_v8, %v615_v41  ;;  %v631_v8 = vmul.f32 %v2641_v3, %v2360_v25  ;;  %v842_v9 = vmul.f32 %v2630_v23, %v2338_v13  ;;  %v372_v13 = vld [vmem:[%s3379_s3 + $0x120] sm:$0xff] }
 0x140   : > { %3502 = vst [vmem:[#allocation57_spill] sm:$0xff] %v2774_v63  ;;  %v2802_v63 = vadd.f32 %v829_v38, %v619_v52  ;;  %v632_v18 = vmul.f32 %v2644_v58, %v2360_v25  ;;  %v2813_v1 = vadd.f32 %v833_v6, %v623_v49  ;;  %v846_v38 = vmul.f32 %v2630_v23, %v2348_v17 }
 0x141   : > { %3503 = vst [vmem:[#allocation58_spill] sm:$0xff] %v2782_v42  ;;  %v2804_v42 = vadd.f32 %v830_v11, %v620_v59  ;;  %v2822_v11 = vadd.f32 %v834_v10, %v624_v47  ;;  %v2824_v25 = vadd.f32 %v837_v35, %v627_v4  ;;  %v635_v52 = vmul.f32 %v2641_v3, %v2370_v29 }
 0x142   : > { %v2799_v41 = vpop.permute.xlu0 %1006  ;;  %1964 = vset.pattern.permute.xlu1 %v3491_v26  ;;  %v636_v59 = vmul.f32 %v2644_v58, %v2370_v29  ;;  %v2835_v6 = vadd.f32 %v838_v60, %v628_v5  ;;  %v850_v49 = vmul.f32 %v2630_v23, %v2358_v21  ;;  %v639_v10 = vmul.f32 %v2641_v3, %v2380_v33 }
 0x143   : > { %3504 = vst [vmem:[#allocation59_spill] sm:$0xff] %v2799_v41  ;;  %1736 = vperm.xlu0 %1968, %v371_v43   ;;  %1600 = vperm.xlu1 %1964, %v2624_v50   ;;  %v2811_v51 = vpop.permute.xlu1 %1001  ;;  %v845_v41 = vmul.f32 %v2628_v15, %v2348_v17  ;;  %v849_v50 = vmul.f32 %v2628_v15, %v2358_v21  ;;  %v330_v17 = vld [vmem:[%s3378_s2 + $0x110] sm:$0xff] }
 0x144   : > { %3505 = vst [vmem:[#allocation60_spill] sm:$0xff] %v2835_v6  ;;  %v640_v47 = vmul.f32 %v2644_v58, %v2380_v33  ;;  %v2845_v43 = vadd.f32 %v841_v14, %v631_v8  ;;  %v2849_v29 = vmul.f32 %v2628_v15, %v2368_v28  ;;  %v2853_v35 = vmul.f32 %v2630_v23, %v2368_v28  ;;  %v373_v8 = vld [vmem:[%s3379_s3 + $0x128] sm:$0xff] }
 0x145   : > { %v2858_v60 = vadd.f32 %v842_v9, %v632_v18  ;;  %v633_v33 = vmul.f32 %v2641_v3, %v2531_v16  ;;  %v634_v5 = vmul.f32 %v2644_v58, %v2531_v16  ;;  %v843_v14 = vmul.f32 %v2628_v15, %v2533_v39 }
 0x146   : > { %v2843_v4 = vpop.permute.xlu0 %1016  ;;  %3506 = vst [vmem:[#allocation61_spill] sm:$0xff] %v2845_v43  ;;  %3507 = vst [vmem:[#allocation62_spill] sm:$0xff] %v2849_v29  ;;  %v844_v28 = vmul.f32 %v2630_v23, %v2533_v39  ;;  %v2873_v9 = vmul.f32 %v2628_v15, %v2378_v32  ;;  %v2877_v18 = vmul.f32 %v2630_v23, %v2378_v32 }
 0x147   : > { %3508 = vst [vmem:[#allocation63_spill] sm:$0xff] %v2853_v35  ;;  %1741 = vperm.xlu0 %1968, %v372_v13   ;;  %1965 = vset.pattern.permute.xlu1 %v3500_v44  ;;  %v2856_v21 = vpop.permute.xlu1 %1011  ;;  %3509 = vst [vmem:[#allocation64_spill] sm:$0xff] %v2858_v60  ;;  %v2879_v16 = vadd.f32 %v845_v41, %v635_v52  ;;  %v2881_v13 = vadd.f32 %v846_v38, %v636_v59 }
 0x148   : > { %1659 = vperm.xlu1 %1965, %v330_v17   ;;  %3510 = vst [vmem:[#allocation65_spill] sm:$0xff] %v2873_v9  ;;  %3511 = vst [vmem:[#allocation66_spill] sm:$0xff] %v2877_v18  ;;  %v2885_v39 = vmul.f32 %v2628_v15, %v2388_v36  ;;  %v2889_v17 = vmul.f32 %v2630_v23, %v2388_v36  ;;  %v2893_v29 = vadd.f32 %v849_v50, %v639_v10 }
 0x149   : > { %3512 = vst [vmem:[#allocation67_spill] sm:$0xff] %v2879_v16  ;;  %3513 = vst [vmem:[#allocation68_spill] sm:$0xff] %v2881_v13  ;;  %v2895_v9 = vadd.f32 %v850_v49, %v640_v47  ;;  %v2899_v32 = vmul.f32 %v2641_v3, %v2390_v37  ;;  %v801_v41 = vmul.f32 %v2628_v15, %v2423_v2 }
 0x14a   : > { %3514 = vst [vmem:[#allocation69_spill] sm:$0xff] %v2885_v39  ;;  %3515 = vst [vmem:[#allocation70_spill] sm:$0xff] %v2889_v17  ;;  %v2891_v35 = vpop.permute.xlu0 %1026  ;;  %v802_v38 = vmul.f32 %v2630_v23, %v2423_v2  ;;  %v805_v36 = vmul.f32 %v2628_v15, %v2433_v12  ;;  %v595_v50 = vmul.f32 %v2641_v3, %v2441_v19  ;;  %v375_v2 = vld [vmem:[%s3379_s3 + $0x138] sm:$0xff] }
 0x14b   : > { %3516 = vst [vmem:[#allocation71_spill] sm:$0xff] %v2891_v35  ;;  %3517 = vst [vmem:[#allocation72_spill] sm:$0xff] %v2893_v29  ;;  %1746 = vperm.xlu0 %1968, %v373_v8   ;;  %v2907_v52 = vpop.permute.xlu1 %1021  ;;  %v596_v59 = vmul.f32 %v2644_v58, %v2441_v19  ;;  %v907_v49 = vadd.f32 %v843_v14, %v633_v33  ;;  %v908_v10 = vadd.f32 %v844_v28, %v634_v5  ;;  %v3547_v35 = vld [vmem:[#allocation33_spill] sm:$0xff] }
 0x14c   : > { %3518 = vst [vmem:[#allocation73_spill] sm:$0xff] %v2895_v9  ;;  %3519 = vst [vmem:[#allocation74_spill] sm:$0xff] %v2899_v32  ;;  %1966 = vset.pattern.permute.xlu1 %v3491_v26  ;;  %v637_v47 = vmul.f32 %v2641_v3, %v2541_v62  ;;  %v638_v8 = vmul.f32 %v2644_v58, %v2541_v62  ;;  %v847_v17 = vmul.f32 %v2628_v15, %v2543_v54  ;;  %v3542_v32 = vld [vmem:[#allocation21_spill] sm:$0xff] }
 0x14d   : > { %3520 = vst [vmem:[#allocation75_spill] sm:$0xff] %v2907_v52  ;;  %v848_v19 = vmul.f32 %v2630_v23, %v2543_v54  ;;  %1604 = vperm.xlu1 %1966, %v2638_v53   ;;  %v807_v33 = vmul.f32 %v2628_v15, %v2443_v20  ;;  %v808_v5 = vmul.f32 %v2630_v23, %v2443_v20  ;;  %v368_v20 = vld [vmem:[%s3379_s3 + $0x100] sm:$0xff] }
 0x14e   : > { %v601_v14 = vmul.f32 %v2641_v3, %v2451_v30  ;;  %v602_v62 = vmul.f32 %v2644_v58, %v2451_v30  ;;  %v1037_v28 = vpop.permute.xlu0 %1036  ;;  %v811_v39 = vmul.f32 %v2628_v15, %v2453_v31  ;;  %v812_v54 = vmul.f32 %v2630_v23, %v2453_v31 }
 0x14f   : > { %v2938_v53 = vadd.f32 %v1037_v28, %v907_v49  ;;  %v2940_v18 = vadd.f32 %v1037_v28, %v908_v10  ;;  %1756 = vperm.xlu0 %1968, %v375_v2   ;;  %v2942_v9 = vpop.permute.xlu1 %1031  ;;  %v641_v30 = vmul.f32 %v2641_v3, %v2551_v7  ;;  %v642_v29 = vmul.f32 %v2644_v58, %v2551_v7 }
 0x150   : > { %3523 = vst [vmem:[#allocation78_spill] sm:$0xff] %v2942_v9  ;;  %v851_v31 = vmul.f32 %v2628_v15, %v2553_v57  ;;  %v852_v49 = vmul.f32 %v2630_v23, %v2553_v57  ;;  %v2957_v10 = vmul.f32 %v2644_v58, %v2390_v37  ;;  %v806_v2 = vmul.f32 %v2630_v23, %v2433_v12 }
 0x151   : > { %3521 = vst [vmem:[#allocation76_spill] sm:$0xff] %v2938_v53  ;;  %3522 = vst [vmem:[#allocation77_spill] sm:$0xff] %v2940_v18  ;;  %1967 = vset.pattern.permute.xlu1 %v3500_v44  ;;  %v911_v28 = vadd.f32 %v847_v17, %v637_v47  ;;  %v912_v18 = vadd.f32 %v848_v19, %v638_v8  ;;  %v2963_v53 = vadd.f32 %v801_v41, %v2675_v24  ;;  %v3530_v19 = vld [vmem:[#allocation15_spill] sm:$0xff] }
 0x152   : > { %3524 = vst [vmem:[#allocation79_spill] sm:$0xff] %v2957_v10  ;;  %v2966_v7 = vadd.f32 %v802_v38, %v2679_v46  ;;  %v2969_v13 = vadd.f32 %v807_v33, %v2708_v56  ;;  %v2971_v57 = vadd.f32 %v805_v36, %v595_v50  ;;  %v1047_v37 = vpop.permute.xlu0 %1046  ;;  %1721 = vperm.xlu1 %1967, %v368_v20   ;;  %v3528_v36 = vld [vmem:[#allocation29_spill] sm:$0xff] }
 0x153   : > { %v2974_v16 = vadd.f32 %v808_v5, %v2712_v22  ;;  %v2976_v12 = vadd.f32 %v806_v2, %v596_v59  ;;  %v2978_v17 = vadd.f32 %v1047_v37, %v911_v28  ;;  %v2980_v47 = vadd.f32 %v1047_v37, %v912_v18  ;;  %v2982_v24 = vpop.permute.xlu1 %1041  ;;  %v3529_v59 = vld [vmem:[#allocation30_spill] sm:$0xff]  ;;  %v3531_v5 = vld [vmem:[#allocation16_spill] sm:$0xff]  ;;  %v3533_v20 = vld [vmem:[#allocation17_spill] sm:$0xff] }
 0x154   : > { %3527 = vst [vmem:[#allocation82_spill] sm:$0xff] %v2982_v24  ;;  %v2984_v46 = vadd.f32 %v811_v39, %v601_v14  ;;  %v2986_v41 = vadd.f32 %v812_v54, %v602_v62  ;;  %v915_v56 = vadd.f32 %v851_v31, %v641_v30  ;;  %v916_v38 = vadd.f32 %v852_v49, %v642_v29  ;;  %v3532_v54 = vld [vmem:[#allocation6_spill] sm:$0xff] }
 0x155   : > { %3525 = vst [vmem:[#allocation80_spill] sm:$0xff] %v2978_v17  ;;  %3526 = vst [vmem:[#allocation81_spill] sm:$0xff] %v2980_v47  ;;  %v645_v50 = vmul.f32 %v2641_v3, %v3528_v36  ;;  %v646_v22 = vmul.f32 %v2644_v58, %v3528_v36  ;;  %v855_v8 = vmul.f32 %v2628_v15, %v3529_v59  ;;  %v332_v37 = vld [vmem:[%s3378_s2 + $0x120] sm:$0xff]  ;;  %v3537_v36 = vld [vmem:[#allocation31_spill] sm:$0xff] }
 0x156   : > { %v856_v18 = vmul.f32 %v2630_v23, %v3529_v59  ;;  %v605_v39 = vmul.f32 %v2641_v3, %v3530_v19  ;;  %v606_v33 = vmul.f32 %v2644_v58, %v3530_v19  ;;  %v815_v29 = vmul.f32 %v2628_v15, %v3531_v5  ;;  %v1057_v62 = vpop.permute.xlu0 %1056  ;;  %1559 = vperm.xlu1 %1967, %v3532_v54   ;;  %v3540_v47 = vld [vmem:[#allocation19_spill] sm:$0xff] }
 0x157   : > { %v816_v14 = vmul.f32 %v2630_v23, %v3531_v5  ;;  %v609_v30 = vmul.f32 %v2641_v3, %v3533_v20  ;;  %v610_v31 = vmul.f32 %v2644_v58, %v3533_v20  ;;  %v3009_v49 = vadd.f32 %v1057_v62, %v915_v56  ;;  %v3013_v28 = vpop.permute.xlu1 %1051  ;;  %v3538_v5 = vld [vmem:[#allocation32_spill] sm:$0xff] }
 0x158   : > { %v3011_v2 = vadd.f32 %v1057_v62, %v916_v38  ;;  %3536 = vst [vmem:[#allocation15_spill] sm:$0xff] %v3013_v28  ;;  %v649_v59 = vmul.f32 %v2641_v3, %v3537_v36  ;;  %v650_v19 = vmul.f32 %v2644_v58, %v3537_v36  ;;  %v859_v54 = vmul.f32 %v2628_v15, %v3538_v5  ;;  %v3539_v38 = vld [vmem:[#allocation18_spill] sm:$0xff]  ;;  %v3541_v28 = vld [vmem:[#allocation20_spill] sm:$0xff] }
 0x159   : > { %3534 = vst [vmem:[#allocation29_spill] sm:$0xff] %v3009_v49  ;;  %v860_v56 = vmul.f32 %v2630_v23, %v3538_v5  ;;  %v819_v62 = vmul.f32 %v2628_v15, %v3539_v38  ;;  %v820_v20 = vmul.f32 %v2630_v23, %v3539_v38  ;;  %v920_v49 = vadd.f32 %v856_v18, %v646_v22  ;;  %v3546_v38 = vld [vmem:[#allocation22_spill] sm:$0xff] }
 0x15a   : > { %3535 = vst [vmem:[#allocation30_spill] sm:$0xff] %v3011_v2  ;;  %v919_v2 = vadd.f32 %v855_v8, %v645_v50  ;;  %v613_v17 = vmul.f32 %v2641_v3, %v3540_v47  ;;  %v614_v36 = vmul.f32 %v2644_v58, %v3540_v47  ;;  %v823_v24 = vmul.f32 %v2628_v15, %v3541_v28  ;;  %v1067_v10 = vpop.permute.xlu0 %1066  ;;  %v370_v47 = vld [vmem:[%s3379_s3 + $0x110] sm:$0xff] }
 0x15b   : > { %v824_v5 = vmul.f32 %v2630_v23, %v3541_v28  ;;  %1669 = vperm.xlu1 %1967, %v332_v37   ;;  %v617_v60 = vmul.f32 %v2641_v3, %v3542_v32  ;;  %v618_v50 = vmul.f32 %v2644_v58, %v3542_v32  ;;  %v3044_v8 = vadd.f32 %v1067_v10, %v920_v49  ;;  %v3046_v18 = vpop.permute.xlu1 %1061  ;;  %v3548_v49 = vld [vmem:[#allocation34_spill] sm:$0xff] }
 0x15c   : > { %v3042_v22 = vadd.f32 %v1067_v10, %v919_v2  ;;  %3545 = vst [vmem:[#allocation17_spill] sm:$0xff] %v3046_v18  ;;  %v827_v28 = vmul.f32 %v2628_v15, %v3546_v38  ;;  %v828_v37 = vmul.f32 %v2630_v23, %v3546_v38  ;;  %v923_v9 = vadd.f32 %v859_v54, %v649_v59 }
 0x15d   : > { %3544 = vst [vmem:[#allocation6_spill] sm:$0xff] %v3044_v8  ;;  %v924_v43 = vadd.f32 %v860_v56, %v650_v19  ;;  %v653_v32 = vmul.f32 %v2641_v3, %v3547_v35  ;;  %v654_v10 = vmul.f32 %v2644_v58, %v3547_v35  ;;  %v863_v2 = vmul.f32 %v2628_v15, %v3548_v49 }
 0x15e   : > { %3543 = vst [vmem:[#allocation16_spill] sm:$0xff] %v3042_v22  ;;  %v864_v8 = vmul.f32 %v2630_v23, %v3548_v49  ;;  %v3063_v22 = vadd.f32 %v815_v29, %v605_v39  ;;  %v3065_v18 = vadd.f32 %v816_v14, %v606_v33  ;;  %v3067_v6 = vadd.f32 %v819_v62, %v609_v30  ;;  %v1077_v19 = vpop.permute.xlu0 %1076  ;;  %v3552_v39 = vld [vmem:[#allocation23_spill] sm:$0xff]  ;;  %v3554_v62 = vld [vmem:[#allocation24_spill] sm:$0xff] }
 0x15f   : > { %v3069_v59 = vadd.f32 %v820_v20, %v610_v31  ;;  %1731 = vperm.xlu1 %1967, %v370_v47   ;;  %v3071_v54 = vadd.f32 %v823_v24, %v613_v17  ;;  %v3073_v56 = vadd.f32 %v824_v5, %v614_v36  ;;  %v3075_v35 = vadd.f32 %v1077_v19, %v923_v9  ;;  %v3079_v52 = vpop.permute.xlu1 %1071  ;;  %v3553_v17 = vld [vmem:[#allocation36_spill] sm:$0xff]  ;;  %v3555_v5 = vld [vmem:[#allocation49_spill] sm:$0xff] }
 0x160   : > { %v3077_v38 = vadd.f32 %v1077_v19, %v924_v43  ;;  %3551 = vst [vmem:[#allocation18_spill] sm:$0xff] %v3079_v52  ;;  %v621_v33 = vmul.f32 %v2641_v3, %v3552_v39  ;;  %v622_v29 = vmul.f32 %v2644_v58, %v3552_v39  ;;  %v3085_v14 = vadd.f32 %v827_v28, %v617_v60  ;;  %v3556_v47 = vld [vmem:[#allocation37_spill] sm:$0xff]  ;;  %v3557_v28 = vld [vmem:[#allocation50_spill] sm:$0xff]  ;;  %v3563_v39 = vld [vmem:[#allocation27_spill] sm:$0xff] }
 0x161   : > { %3549 = vst [vmem:[#allocation31_spill] sm:$0xff] %v3075_v35  ;;  %v3087_v30 = vadd.f32 %v828_v37, %v618_v50  ;;  %v1089_v24 = vadd.f32 %v3553_v17, %v2963_v53  ;;  %v1090_v9 = vadd.f32 %v3553_v17, %v2966_v7  ;;  %v927_v43 = vadd.f32 %v863_v2, %v653_v32  ;;  %v3558_v53 = vld [vmem:[#allocation25_spill] sm:$0xff]  ;;  %v3562_v2 = vld [vmem:[#allocation26_spill] sm:$0xff] }
 0x162   : > { %3550 = vst [vmem:[#allocation32_spill] sm:$0xff] %v3077_v38  ;;  %v928_v31 = vadd.f32 %v864_v8, %v654_v10  ;;  %v831_v20 = vmul.f32 %v2628_v15, %v3554_v62  ;;  %v832_v36 = vmul.f32 %v2630_v23, %v3554_v62  ;;  %v1091_v60 = vadd.f32 %v3556_v47, %v3555_v5  ;;  %v1087_v37 = vpop.permute.xlu0 %1086  ;;  %v3569_v52 = vld [vmem:[#allocation53_spill] sm:$0xff] }
 0x163   : > { %v1092_v50 = vadd.f32 %v3556_v47, %v3557_v28  ;;  %1969 = vset.pattern.permute.xlu1 %v3491_v26  ;;  %v625_v7 = vmul.f32 %v2641_v3, %v3558_v53  ;;  %v626_v8 = vmul.f32 %v2644_v58, %v3558_v53  ;;  %v3106_v32 = vadd.f32 %v1087_v37, %v927_v43  ;;  %v3111_v49 = vpop.permute.xlu1 %1081  ;;  %v3564_v43 = vld [vmem:[#allocation28_spill] sm:$0xff]  ;;  %v333_v28 = vld [vmem:[%s3378_s2 + $0x128] sm:$0xff] }
 0x164   : > { %v3108_v10 = vadd.f32 %v1087_v37, %v928_v31  ;;  %1612 = vperm.xlu1 %1969, %v2744_v0   ;;  %3561 = vst [vmem:[#allocation21_spill] sm:$0xff] %v3111_v49  ;;  %v835_v19 = vmul.f32 %v2628_v15, %v3562_v2  ;;  %v836_v26 = vmul.f32 %v2630_v23, %v3562_v2  ;;  %v1153_v5 = vmax.f32 %v1089_v24, 0.0  ;;  %v3565_v37 = vld [vmem:[#allocation40_spill] sm:$0xff] }
 0x165   : > { %3559 = vst [vmem:[#allocation19_spill] sm:$0xff] %v3106_v32  ;;  %v629_v17 = vmul.f32 %v2641_v3, %v3563_v39  ;;  %v630_v62 = vmul.f32 %v2644_v58, %v3563_v39  ;;  %v839_v31 = vmul.f32 %v2628_v15, %v3564_v43  ;;  %v840_v0 = vmul.f32 %v2630_v23, %v3564_v43  ;;  %v3566_v15 = vld [vmem:[#allocation39_spill] sm:$0xff] }
 0x166   : > { %3560 = vst [vmem:[#allocation20_spill] sm:$0xff] %v3108_v10  ;;  %v1154_v47 = vmax.f32 %v1090_v9, 0.0  ;;  %v1093_v53 = vadd.f32 %v3565_v37, %v2971_v57  ;;  %v1094_v2 = vadd.f32 %v3565_v37, %v2976_v12  ;;  %v1225_v10 = vpop.permute.xlu0 %1224  ;;  %v1155_v39 = vmax.f32 %v1091_v60, 0.0  ;;  %v3567_v60 = vld [vmem:[#allocation52_spill] sm:$0xff] }
 0x167   : > { %v1156_v32 = vmax.f32 %v1092_v50, 0.0  ;;  %v1095_v38 = vadd.f32 %v3566_v15, %v2969_v13  ;;  %v1096_v24 = vadd.f32 %v3566_v15, %v2974_v16  ;;  %v3136_v9 = vadd.f32 %v831_v20, %v621_v33  ;;  %v1220_v23 = vpop.permute.xlu1 %1219  ;;  %v3568_v50 = vld [vmem:[#allocation44_spill] sm:$0xff] }
 0x168   : > { %v3138_v43 = vadd.f32 %v832_v36, %v622_v29  ;;  %1970 = vset.pattern.permute.xlu1 %v3500_v44  ;;  %v1379_v57 = vmul.f32 %v1225_v10, %v1155_v39  ;;  %v1377_v49 = vmul.f32 %v1220_v23, %v1153_v5  ;;  %v1378_v12 = vmul.f32 %v1220_v23, %v1154_v47  ;;  %v334_v44 = vld [vmem:[%s3378_s2 + $0x130] sm:$0xff] }
 0x169   : > { %v1380_v35 = vmul.f32 %v1225_v10, %v1156_v32  ;;  %1674 = vperm.xlu1 %1970, %v333_v28   ;;  %v1097_v37 = vadd.f32 %v3568_v50, %v3567_v60  ;;  %v1098_v13 = vadd.f32 %v3568_v50, %v3569_v52  ;;  %v3145_v58 = vadd.f32 %v835_v19, %v625_v7  ;;  %v3570_v10 = vld [vmem:[#allocation41_spill] sm:$0xff] }
 0x16a   : > { %v3147_v15 = vadd.f32 %v836_v26, %v626_v8  ;;  %v1157_v16 = vmax.f32 %v1093_v53, 0.0  ;;  %v1158_v33 = vmax.f32 %v1094_v2, 0.0  ;;  %v3152_v29 = vadd.f32 %v839_v31, %v629_v17  ;;  %v1235_v20 = vpop.permute.xlu0 %1234 }
 0x16b   : > { %v3154_v23 = vadd.f32 %v840_v0, %v630_v62  ;;  %v1159_v36 = vmax.f32 %v1095_v38, 0.0  ;;  %v1160_v32 = vmax.f32 %v1096_v24, 0.0  ;;  %v1099_v52 = vadd.f32 %v3570_v10, %v2984_v46  ;;  %v1230_v8 = vpop.permute.xlu1 %1229  ;;  %v3571_v62 = vld [vmem:[#allocation47_spill] sm:$0xff]  ;;  %v335_v46 = vld [vmem:[%s3378_s2 + $0x138] sm:$0xff]  ;;  %v3572_v24 = vld [vmem:[#allocation46_spill] sm:$0xff] }
 0x16c   : > { %v1100_v7 = vadd.f32 %v3570_v10, %v2986_v41  ;;  %v1441_v19 = vadd.f32 %v1379_v57, %v1377_v49  ;;  %v1478_v26 = vadd.f32 %v1380_v35, %v1378_v12  ;;  %v1381_v5 = vmul.f32 %v1230_v8, %v1157_v16  ;;  %v3573_v16 = vld [vmem:[#allocation51_spill] sm:$0xff] }
 0x16d   : > { %v1382_v47 = vmul.f32 %v1230_v8, %v1158_v33  ;;  %1679 = vperm.xlu1 %1970, %v334_v44   ;;  %v1161_v28 = vmax.f32 %v1097_v37, 0.0  ;;  %v1162_v17 = vmax.f32 %v1098_v13, 0.0  ;;  %v1101_v31 = vadd.f32 %v3571_v62, %v2737_v55 }
 0x16e   : > { %v1102_v38 = vadd.f32 %v3571_v62, %v2739_v45  ;;  %v1383_v0 = vmul.f32 %v1235_v20, %v1159_v36  ;;  %v1384_v41 = vmul.f32 %v1235_v20, %v1160_v32  ;;  %v1442_v53 = vadd.f32 %v1441_v19, %v1381_v5  ;;  %v1245_v35 = vpop.permute.xlu0 %1244  ;;  %v3574_v19 = vld [vmem:[#allocation48_spill] sm:$0xff] }
 0x16f   : > { %v1479_v49 = vadd.f32 %v1478_v26, %v1382_v47  ;;  %v1163_v2 = vmax.f32 %v1099_v52, 0.0  ;;  %v1164_v39 = vmax.f32 %v1100_v7, 0.0  ;;  %v1103_v57 = vadd.f32 %v3572_v24, %v3063_v22  ;;  %v1240_v12 = vpop.permute.xlu1 %1239  ;;  %v374_v22 = vld [vmem:[%s3379_s3 + $0x130] sm:$0xff] }
 0x170   : > { %v1104_v55 = vadd.f32 %v3572_v24, %v3065_v18  ;;  %v1385_v60 = vmul.f32 %v1240_v12, %v1161_v28  ;;  %v1386_v45 = vmul.f32 %v1240_v12, %v1162_v17  ;;  %v1443_v50 = vadd.f32 %v1442_v53, %v1383_v0 }
 0x171   : > { %v1480_v37 = vadd.f32 %v1479_v49, %v1384_v41  ;;  %1684 = vperm.xlu1 %1970, %v335_v46   ;;  %v1165_v13 = vmax.f32 %v1101_v31, 0.0  ;;  %v1166_v44 = vmax.f32 %v1102_v38, 0.0  ;;  %v1105_v33 = vadd.f32 %v3573_v16, %v2750_v48  ;;  %v3575_v38 = vld [vmem:[#allocation55_spill] sm:$0xff] }
 0x172   : > { %v1106_v20 = vadd.f32 %v3573_v16, %v2752_v40  ;;  %v1387_v36 = vmul.f32 %v1245_v35, %v1163_v2  ;;  %v1388_v18 = vmul.f32 %v1245_v35, %v1164_v39  ;;  %v1444_v32 = vadd.f32 %v1443_v50, %v1385_v60  ;;  %v1255_v52 = vpop.permute.xlu0 %1254  ;;  %v3576_v39 = vld [vmem:[#allocation54_spill] sm:$0xff] }
 0x173   : > { %v1481_v10 = vadd.f32 %v1480_v37, %v1386_v45  ;;  %v1167_v7 = vmax.f32 %v1103_v57, 0.0  ;;  %v1168_v8 = vmax.f32 %v1104_v55, 0.0  ;;  %v1107_v26 = vadd.f32 %v3574_v19, %v3067_v6  ;;  %v1250_v5 = vpop.permute.xlu1 %1249  ;;  %v3577_v37 = vld [vmem:[#allocation58_spill] sm:$0xff] }
 0x174   : > { %v1108_v48 = vadd.f32 %v3574_v19, %v3069_v59  ;;  %v1389_v47 = vmul.f32 %v1250_v5, %v1165_v13  ;;  %v1390_v40 = vmul.f32 %v1250_v5, %v1166_v44  ;;  %v1445_v28 = vadd.f32 %v1444_v32, %v1387_v36  ;;  %v3578_v13 = vld [vmem:[#allocation57_spill] sm:$0xff]  ;;  %v3579_v32 = vld [vmem:[#allocation56_spill] sm:$0xff] }
 0x175   : > { %v1482_v17 = vadd.f32 %v1481_v10, %v1388_v18  ;;  %1751 = vperm.xlu1 %1970, %v374_v22   ;;  %v1169_v62 = vmax.f32 %v1105_v33, 0.0  ;;  %v1170_v31 = vmax.f32 %v1106_v20, 0.0  ;;  %v1109_v46 = vadd.f32 %v3575_v38, %v2769_v61 }
 0x176   : > { %v1110_v0 = vadd.f32 %v3575_v38, %v2771_v27  ;;  %v1391_v41 = vmul.f32 %v1255_v52, %v1167_v7  ;;  %v1392_v53 = vmul.f32 %v1255_v52, %v1168_v8  ;;  %v1446_v6 = vadd.f32 %v1445_v28, %v1389_v47  ;;  %v1265_v35 = vpop.permute.xlu0 %1264 }
 0x177   : > { %v1483_v49 = vadd.f32 %v1482_v17, %v1390_v40  ;;  %v1171_v59 = vmax.f32 %v1107_v26, 0.0  ;;  %v1172_v2 = vmax.f32 %v1108_v48, 0.0  ;;  %v1111_v24 = vadd.f32 %v3576_v39, %v3071_v54  ;;  %v1260_v55 = vpop.permute.xlu1 %1259 }
 0x178   : > { %v1112_v57 = vadd.f32 %v3576_v39, %v3073_v56  ;;  %v1393_v12 = vmul.f32 %v1260_v55, %v1169_v62  ;;  %v1394_v60 = vmul.f32 %v1260_v55, %v1170_v31  ;;  %v1447_v61 = vadd.f32 %v1446_v6, %v1391_v41 }
 0x179   : > { %v1484_v45 = vadd.f32 %v1483_v49, %v1392_v53  ;;  %v1173_v50 = vmax.f32 %v1109_v46, 0.0  ;;  %v1174_v27 = vmax.f32 %v1110_v0, 0.0  ;;  %v1113_v44 = vadd.f32 %v3578_v13, %v3577_v37  ;;  %v3580_v46 = vld [vmem:[#allocation59_spill] sm:$0xff] }
 0x17a   : > { %v1114_v16 = vadd.f32 %v3578_v13, %v2793_v34  ;;  %v1395_v33 = vmul.f32 %v1265_v35, %v1171_v59  ;;  %v1396_v20 = vmul.f32 %v1265_v35, %v1172_v2  ;;  %v1448_v22 = vadd.f32 %v1447_v61, %v1393_v12  ;;  %v1275_v36 = vpop.permute.xlu0 %1274 }
 0x17b   : > { %v1485_v54 = vadd.f32 %v1484_v45, %v1394_v60  ;;  %v1175_v18 = vmax.f32 %v1111_v24, 0.0  ;;  %v1176_v56 = vmax.f32 %v1112_v57, 0.0  ;;  %v1115_v10 = vadd.f32 %v3579_v32, %v3085_v14  ;;  %v1270_v7 = vpop.permute.xlu1 %1269 }
 0x17c   : > { %v1116_v52 = vadd.f32 %v3579_v32, %v3087_v30  ;;  %v1397_v8 = vmul.f32 %v1270_v7, %v1173_v50  ;;  %v1398_v19 = vmul.f32 %v1270_v7, %v1174_v27  ;;  %v1449_v26 = vadd.f32 %v1448_v22, %v1395_v33 }
 0x17d   : > { %v1486_v48 = vadd.f32 %v1485_v54, %v1396_v20  ;;  %v1177_v5 = vmax.f32 %v1113_v44, 0.0  ;;  %v1178_v34 = vmax.f32 %v1114_v16, 0.0  ;;  %v1117_v47 = vadd.f32 %v2811_v51, %v2802_v63  ;;  %v3582_v16 = vld [vmem:[#allocation60_spill] sm:$0xff] }
 0x17e   : > { %v1118_v40 = vadd.f32 %v2811_v51, %v2804_v42  ;;  %v1399_v28 = vmul.f32 %v1275_v36, %v1175_v18  ;;  %v1400_v17 = vmul.f32 %v1275_v36, %v1176_v56  ;;  %v1450_v62 = vadd.f32 %v1449_v26, %v1397_v8  ;;  %v1285_v31 = vpop.permute.xlu0 %1284 }
 0x17f   : > { %v1487_v14 = vadd.f32 %v1486_v48, %v1398_v19  ;;  %v1179_v38 = vmax.f32 %v1115_v10, 0.0  ;;  %v1180_v30 = vmax.f32 %v1116_v52, 0.0  ;;  %v1119_v0 = vadd.f32 %v3580_v46, %v3136_v9  ;;  %v1280_v53 = vpop.permute.xlu1 %1279  ;;  %v3584_v48 = vld [vmem:[#allocation61_spill] sm:$0xff] }
 0x180   : > { %v1120_v41 = vadd.f32 %v3580_v46, %v3138_v43  ;;  %v1401_v6 = vmul.f32 %v1280_v53, %v1177_v5  ;;  %v1402_v49 = vmul.f32 %v1280_v53, %v1178_v34  ;;  %v1451_v63 = vadd.f32 %v1450_v62, %v1399_v28  ;;  %v3585_v5 = vld [vmem:[#allocation78_spill] sm:$0xff] }
 0x181   : > { %v1488_v35 = vadd.f32 %v1487_v14, %v1400_v17  ;;  %v1181_v59 = vmax.f32 %v1117_v47, 0.0  ;;  %v1182_v42 = vmax.f32 %v1118_v40, 0.0  ;;  %v1121_v51 = vadd.f32 %v2856_v21, %v2813_v1  ;;  %v3586_v47 = vld [vmem:[#allocation64_spill] sm:$0xff] }
 0x182   : > { %v1122_v2 = vadd.f32 %v2856_v21, %v2822_v11  ;;  %v1403_v39 = vmul.f32 %v1285_v31, %v1179_v38  ;;  %v1404_v24 = vmul.f32 %v1285_v31, %v1180_v30  ;;  %v1452_v57 = vadd.f32 %v1451_v63, %v1401_v6  ;;  %v1295_v55 = vpop.permute.xlu0 %1294  ;;  %v3581_v21 = vld [vmem:[#allocation75_spill] sm:$0xff]  ;;  %v3587_v38 = vld [vmem:[#allocation74_spill] sm:$0xff] }
 0x183   : > { %v1489_v9 = vadd.f32 %v1488_v35, %v1402_v49  ;;  %v1183_v12 = vmax.f32 %v1119_v0, 0.0  ;;  %v1184_v43 = vmax.f32 %v1120_v41, 0.0  ;;  %v1123_v60 = vadd.f32 %v2843_v4, %v3145_v58  ;;  %v1290_v45 = vpop.permute.xlu1 %1289  ;;  %v3588_v30 = vld [vmem:[#allocation62_spill] sm:$0xff]  ;;  %v3589_v0 = vld [vmem:[#allocation79_spill] sm:$0xff] }
 0x184   : > { %v1124_v61 = vadd.f32 %v2843_v4, %v3147_v15  ;;  %v1405_v50 = vmul.f32 %v1290_v45, %v1181_v59  ;;  %v1406_v27 = vmul.f32 %v1290_v45, %v1182_v42  ;;  %v1453_v1 = vadd.f32 %v1452_v57, %v1403_v39  ;;  %v3583_v15 = vld [vmem:[#allocation71_spill] sm:$0xff]  ;;  %v3592_v39 = vld [vmem:[#allocation82_spill] sm:$0xff]  ;;  %v3593_v57 = vld [vmem:[#allocation68_spill] sm:$0xff] }
 0x185   : > { %v1490_v37 = vadd.f32 %v1489_v9, %v1404_v24  ;;  %v1185_v13 = vmax.f32 %v1121_v51, 0.0  ;;  %v1186_v11 = vmax.f32 %v1122_v2, 0.0  ;;  %v1125_v44 = vadd.f32 %v3581_v21, %v2824_v25  ;;  %v3590_v41 = vld [vmem:[#allocation63_spill] sm:$0xff]  ;;  %v3594_v45 = vld [vmem:[#allocation10_spill] sm:$0xff] }
 0x186   : > { %v1126_v33 = vadd.f32 %v3581_v21, %v3582_v16  ;;  %v1407_v20 = vmul.f32 %v1295_v55, %v1183_v12  ;;  %v1408_v22 = vmul.f32 %v1295_v55, %v1184_v43  ;;  %v1454_v54 = vadd.f32 %v1453_v1, %v1405_v50  ;;  %v1305_v36 = vpop.permute.xlu0 %1304  ;;  %v3591_v2 = vld [vmem:[#allocation67_spill] sm:$0xff] }
 0x187   : > { %v1491_v58 = vadd.f32 %v1490_v37, %v1406_v27  ;;  %v1187_v18 = vmax.f32 %v1123_v60, 0.0  ;;  %v1188_v4 = vmax.f32 %v1124_v61, 0.0  ;;  %v1127_v56 = vadd.f32 %v3583_v15, %v3152_v29  ;;  %v1300_v10 = vpop.permute.xlu1 %1299  ;;  %v3595_v27 = vld [vmem:[#allocation45_spill] sm:$0xff]  ;;  %v3596_v37 = vld [vmem:[#allocation76_spill] sm:$0xff] }
 0x188   : > { %v1128_v32 = vadd.f32 %v3583_v15, %v3154_v23  ;;  %v1409_v52 = vmul.f32 %v1300_v10, %v1185_v13  ;;  %v1410_v7 = vmul.f32 %v1300_v10, %v1186_v11  ;;  %v1455_v25 = vadd.f32 %v1454_v54, %v1407_v20  ;;  %v3597_v11 = vld [vmem:[#allocation77_spill] sm:$0xff] }
 0x189   : > { %v1492_v8 = vadd.f32 %v1491_v58, %v1408_v22  ;;  %v1189_v19 = vmax.f32 %v1125_v44, 0.0  ;;  %v1190_v26 = vmax.f32 %v1126_v33, 0.0  ;;  %v1129_v34 = vadd.f32 %v3585_v5, %v3584_v48  ;;  %v3600_v15 = vld [vmem:[#allocation73_spill] sm:$0xff] }
 0x18a   : > { %v1130_v40 = vadd.f32 %v3585_v5, %v3586_v47  ;;  %v1411_v28 = vmul.f32 %v1305_v36, %v1187_v18  ;;  %v1412_v17 = vmul.f32 %v1305_v36, %v1188_v4  ;;  %v1456_v62 = vadd.f32 %v1455_v25, %v1409_v52  ;;  %v1315_v14 = vpop.permute.xlu0 %1314  ;;  %v3598_v36 = vld [vmem:[#allocation72_spill] sm:$0xff]  ;;  %v3599_v18 = vld [vmem:[#allocation15_spill] sm:$0xff]  ;;  %v3603_v5 = vld [vmem:[#allocation65_spill] sm:$0xff] }
 0x18b   : > { %v1493_v29 = vadd.f32 %v1492_v8, %v1410_v7  ;;  %v1191_v31 = vmax.f32 %v1127_v56, 0.0  ;;  %v1192_v23 = vmax.f32 %v1128_v32, 0.0  ;;  %v917_v46 = vadd.f32 %v3588_v30, %v3587_v38  ;;  %v1310_v6 = vpop.permute.xlu1 %1309  ;;  %v3601_v8 = vld [vmem:[#allocation80_spill] sm:$0xff]  ;;  %v3604_v47 = vld [vmem:[#allocation66_spill] sm:$0xff]  ;;  %v3605_v38 = vld [vmem:[#allocation17_spill] sm:$0xff] }
 0x18c   : > { %v918_v53 = vadd.f32 %v3590_v41, %v3589_v0  ;;  %v1413_v49 = vmul.f32 %v1310_v6, %v1189_v19  ;;  %v1414_v63 = vmul.f32 %v1310_v6, %v1190_v26  ;;  %v1457_v35 = vadd.f32 %v1456_v62, %v1411_v28  ;;  %v3602_v26 = vld [vmem:[#allocation81_spill] sm:$0xff] }
 0x18d   : > { %v1494_v59 = vadd.f32 %v1493_v29, %v1412_v17  ;;  %v1193_v42 = vmax.f32 %v1129_v34, 0.0  ;;  %v1194_v51 = vmax.f32 %v1130_v40, 0.0  ;;  %v1133_v24 = vadd.f32 %v3592_v39, %v3591_v2  ;;  %v3607_v2 = vld [vmem:[#allocation29_spill] sm:$0xff] }
 0x18e   : > { %v1134_v9 = vadd.f32 %v3592_v39, %v3593_v57  ;;  %v1415_v55 = vmul.f32 %v1315_v14, %v1191_v31  ;;  %v1416_v12 = vmul.f32 %v1315_v14, %v1192_v23  ;;  %v1458_v43 = vadd.f32 %v1457_v35, %v1413_v49  ;;  %v1325_v61 = vpop.permute.xlu0 %1324 }
 0x18f   : > { %v1495_v60 = vadd.f32 %v1494_v59, %v1414_v63  ;;  %v647_v50 = vmul.f32 %v2641_v3, %v3594_v45  ;;  %v648_v1 = vmul.f32 %v3595_v27, %v3594_v45  ;;  %v1195_v13 = vmax.f32 %v3596_v37, 0.0  ;;  %v1320_v44 = vpop.permute.xlu1 %1319  ;;  %v3606_v59 = vld [vmem:[#allocation12_spill] sm:$0xff] }
 0x190   : > { %v1196_v21 = vmax.f32 %v3597_v11, 0.0  ;;  %v1417_v16 = vmul.f32 %v1320_v44, %v1193_v42  ;;  %v1418_v33 = vmul.f32 %v1320_v44, %v1194_v51  ;;  %v1459_v20 = vadd.f32 %v1458_v43, %v1415_v55  ;;  %v3610_v44 = vld [vmem:[#allocation16_spill] sm:$0xff] }
 0x191   : > { %v1496_v22 = vadd.f32 %v1495_v60, %v1416_v12  ;;  %v1197_v54 = vmax.f32 %v1133_v24, 0.0  ;;  %v1198_v58 = vmax.f32 %v1134_v9, 0.0  ;;  %v1137_v4 = vadd.f32 %v3599_v18, %v3598_v36  ;;  %v3608_v24 = vld [vmem:[#allocation30_spill] sm:$0xff] }
 0x192   : > { %v1138_v56 = vadd.f32 %v3599_v18, %v3600_v15  ;;  %v1419_v32 = vmul.f32 %v1325_v61, %v1195_v13  ;;  %v1420_v10 = vmul.f32 %v1325_v61, %v1196_v21  ;;  %v1460_v52 = vadd.f32 %v1459_v20, %v1417_v16  ;;  %v1335_v25 = vpop.permute.xlu0 %1334  ;;  %v3609_v61 = vld [vmem:[#allocation18_spill] sm:$0xff] }
 0x193   : > { %v1497_v7 = vadd.f32 %v1496_v22, %v1418_v33  ;;  %v1199_v19 = vmax.f32 %v3601_v8, 0.0  ;;  %v1200_v48 = vmax.f32 %v3602_v26, 0.0  ;;  %v921_v34 = vadd.f32 %v3603_v5, %v647_v50  ;;  %v1330_v28 = vpop.permute.xlu1 %1329  ;;  %v3611_v33 = vld [vmem:[#allocation6_spill] sm:$0xff]  ;;  %v3612_v22 = vld [vmem:[#allocation69_spill] sm:$0xff] }
 0x194   : > { %v922_v40 = vadd.f32 %v3604_v47, %v648_v1  ;;  %v1421_v17 = vmul.f32 %v1330_v28, %v1197_v54  ;;  %v1422_v62 = vmul.f32 %v1330_v28, %v1198_v58  ;;  %v1461_v29 = vadd.f32 %v1460_v52, %v1419_v32  ;;  %v3613_v58 = vld [vmem:[#allocation70_spill] sm:$0xff]  ;;  %v3615_v47 = vld [vmem:[#allocation31_spill] sm:$0xff]  ;;  %v3616_v28 = vld [vmem:[#allocation32_spill] sm:$0xff] }
 0x195   : > { %v1498_v14 = vadd.f32 %v1497_v7, %v1420_v10  ;;  %v1201_v31 = vmax.f32 %v1137_v4, 0.0  ;;  %v1202_v23 = vmax.f32 %v1138_v56, 0.0  ;;  %v1141_v30 = vadd.f32 %v3605_v38, %v917_v46  ;;  %v3614_v7 = vld [vmem:[#allocation21_spill] sm:$0xff] }
 0x196   : > { %v1142_v0 = vadd.f32 %v3605_v38, %v918_v53  ;;  %v1423_v41 = vmul.f32 %v1335_v25, %v1199_v19  ;;  %v1424_v6 = vmul.f32 %v1335_v25, %v1200_v48  ;;  %v1462_v49 = vadd.f32 %v1461_v29, %v1421_v17  ;;  %v1345_v35 = vpop.permute.xlu0 %1344 }
 0x197   : > { %v1499_v63 = vadd.f32 %v1498_v14, %v1422_v62  ;;  %v651_v42 = vmul.f32 %v2641_v3, %v3606_v59  ;;  %v652_v51 = vmul.f32 %v3595_v27, %v3606_v59  ;;  %v1203_v39 = vmax.f32 %v3607_v2, 0.0  ;;  %v1340_v9 = vpop.permute.xlu1 %1339  ;;  %v3618_v59 = vld [vmem:[#allocation20_spill] sm:$0xff] }
 0x198   : > { %v1204_v57 = vmax.f32 %v3608_v24, 0.0  ;;  %v1425_v55 = vmul.f32 %v1340_v9, %v1201_v31  ;;  %v1426_v46 = vmul.f32 %v1340_v9, %v1202_v23  ;;  %v1463_v12 = vadd.f32 %v1462_v49, %v1423_v41 }
 0x199   : > { %v1500_v53 = vadd.f32 %v1499_v63, %v1424_v6  ;;  %v1205_v43 = vmax.f32 %v1141_v30, 0.0  ;;  %v1206_v60 = vmax.f32 %v1142_v0, 0.0  ;;  %v1145_v45 = vadd.f32 %v3609_v61, %v921_v34  ;;  %v3617_v63 = vld [vmem:[#allocation19_spill] sm:$0xff] }
 0x19a   : > { %v1146_v50 = vadd.f32 %v3609_v61, %v922_v40  ;;  %v1427_v1 = vmul.f32 %v1345_v35, %v1203_v39  ;;  %v1428_v37 = vmul.f32 %v1345_v35, %v1204_v57  ;;  %v1464_v13 = vadd.f32 %v1463_v12, %v1425_v55  ;;  %v1355_v21 = vpop.permute.xlu0 %1354 }
 0x19b   : > { %v1501_v11 = vadd.f32 %v1500_v53, %v1426_v46  ;;  %v1207_v16 = vmax.f32 %v3610_v44, 0.0  ;;  %v1208_v20 = vmax.f32 %v3611_v33, 0.0  ;;  %v925_v54 = vadd.f32 %v3612_v22, %v651_v42  ;;  %v1350_v18 = vpop.permute.xlu1 %1349 }
 0x19c   : > { %v926_v36 = vadd.f32 %v3613_v58, %v652_v51  ;;  %v1429_v4 = vmul.f32 %v1350_v18, %v1205_v43  ;;  %v1430_v15 = vmul.f32 %v1350_v18, %v1206_v60  ;;  %v1465_v56 = vadd.f32 %v1464_v13, %v1427_v1 }
 0x19d   : > { %v1502_v32 = vadd.f32 %v1501_v11, %v1428_v37  ;;  %v1209_v10 = vmax.f32 %v1145_v45, 0.0  ;;  %v1210_v52 = vmax.f32 %v1146_v50, 0.0  ;;  %v1149_v25 = vadd.f32 %v3614_v7, %v925_v54 }
 0x19e   : > { %v1150_v8 = vadd.f32 %v3614_v7, %v926_v36  ;;  %v1431_v19 = vmul.f32 %v1355_v21, %v1207_v16  ;;  %v1432_v26 = vmul.f32 %v1355_v21, %v1208_v20  ;;  %v1466_v48 = vadd.f32 %v1465_v56, %v1429_v4  ;;  %v1365_v34 = vpop.permute.xlu0 %1364 }
 0x19f   : > { %v1503_v5 = vadd.f32 %v1502_v32, %v1430_v15  ;;  %v1211_v40 = vmax.f32 %v3615_v47, 0.0  ;;  %v1212_v17 = vmax.f32 %v3616_v28, 0.0  ;;  %v1360_v62 = vpop.permute.xlu1 %1359  ;;  %v1213_v38 = vmax.f32 %v1149_v25, 0.0 }
 0x1a0   : > { %v1433_v29 = vmul.f32 %v1360_v62, %v1209_v10  ;;  %v1434_v14 = vmul.f32 %v1360_v62, %v1210_v52  ;;  %v1467_v31 = vadd.f32 %v1466_v48, %v1431_v19  ;;  %v1214_v30 = vmax.f32 %v1150_v8, 0.0  ;;  %v3619_v48 = vld [vmem:[#allocation42_spill] sm:$0xff] }
 0x1a1   : > { %v1504_v23 = vadd.f32 %v1503_v5, %v1432_v26  ;;  %v1435_v0 = vmul.f32 %v1365_v34, %v1211_v40  ;;  %v1436_v41 = vmul.f32 %v1365_v34, %v1212_v17  ;;  %v1215_v35 = vmax.f32 %v3617_v63, 0.0  ;;  %v3620_v34 = vld [vmem:[#allocation43_spill] sm:$0xff] }
 0x1a2   : > { %v1468_v6 = vadd.f32 %v1467_v31, %v1433_v29  ;;  %v1216_v42 = vmax.f32 %v3618_v59, 0.0  ;;  %v1375_v51 = vpop.permute.xlu0 %1374  ;;  %v3621_v31 = vld [vmem:[#allocation9_spill] sm:$0xff] }
 0x1a3   : > { %v1505_v49 = vadd.f32 %v1504_v23, %v1434_v14  ;;  %v1370_v2 = vpop.permute.xlu1 %1369  ;;  %v1439_v55 = vmul.f32 %v1375_v51, %v1215_v35  ;;  %v1615_v23 = vmul.f32 %v3621_v31, %v3619_v48 }
 0x1a4   : > { %v1437_v39 = vmul.f32 %v1370_v2, %v1213_v38  ;;  %v1438_v24 = vmul.f32 %v1370_v2, %v1214_v30  ;;  %v1469_v57 = vadd.f32 %v1468_v6, %v1435_v0  ;;  %v1440_v46 = vmul.f32 %v1375_v51, %v1216_v42 }
 0x1a5   : > { %v1506_v9 = vadd.f32 %v1505_v49, %v1436_v41  ;;  %v1616_v38 = vmul.f32 %v3621_v31, %v3620_v34 }
 0x1a6   : > { %v1470_v12 = vadd.f32 %v1469_v57, %v1437_v39  ;;  %v1535_v15 = vpop.permute.xlu0 %1534  ;;  %v3622_v39 = vld [vmem:[#allocation11_spill] sm:$0xff] }
 0x1a7   : > { %v1507_v53 = vadd.f32 %v1506_v9, %v1438_v24  ;;  %v1530_v43 = vpop.permute.xlu1 %1529  ;;  %v1569_v28 = vmul.f32 %v1535_v15, %v2641_v3  ;;  %v1570_v17 = vmul.f32 %v1535_v15, %v3595_v27  ;;  %v1621_v24 = vmul.f32 %v3622_v39, %v3619_v48 }
 0x1a8   : > { %v1471_v60 = vadd.f32 %v1470_v12, %v1439_v55  ;;  %v1567_v62 = vmul.f32 %v1530_v43, %v2641_v3  ;;  %v1568_v29 = vmul.f32 %v1530_v43, %v3595_v27  ;;  %v1622_v57 = vmul.f32 %v3622_v39, %v3620_v34 }
 0x1a9   : > { %v1508_v61 = vadd.f32 %v1507_v53, %v1440_v46 }
 0x1aa   : > { %v1472_v45 = vrot.slane %v1471_v60, 4  ;;  %v1545_v32 = vpop.permute.xlu0 %1544  ;;  %v1631_v63 = vadd.f32 %v1615_v23, %v1567_v62  ;;  %v1632_v35 = vadd.f32 %v1616_v38, %v1568_v29 }
 0x1ab   : > { %v1509_v50 = vrot.slane %v1508_v61, 4  ;;  %v1540_v1 = vpop.permute.xlu1 %1539  ;;  %v1573_v59 = vmul.f32 %v1545_v32, %v2641_v3  ;;  %v1574_v42 = vmul.f32 %v1545_v32, %v3595_v27 }
 0x1ac   : > { %v1473_v37 = vadd.f32 %v1472_v45, %v1471_v60  ;;  %v1571_v51 = vmul.f32 %v1540_v1, %v2641_v3  ;;  %v1572_v2 = vmul.f32 %v1540_v1, %v3595_v27 }
 0x1ad   : > { %v1510_v13 = vadd.f32 %v1509_v50, %v1508_v61  ;;  %v1637_v45 = vadd.f32 %v1621_v24, %v1573_v59  ;;  %v1638_v50 = vadd.f32 %v1622_v57, %v1574_v42 }
 0x1ae   : > { %v1474_v11 = vrot.slane %v1473_v37, 2  ;;  %v1655_v52 = vpop.permute.xlu0 %1654 }
 0x1af   : > { %v1511_v21 = vrot.slane %v1510_v13, 2  ;;  %v1550_v44 = vpop.permute.xlu1 %1549 }
 0x1b0   : > { %v1475_v16 = vadd.f32 %v1474_v11, %v1473_v37  ;;  %v1575_v1 = vmul.f32 %v1550_v44, %v2641_v3  ;;  %v1576_v11 = vmul.f32 %v1550_v44, %v3595_v27 }
 0x1b1   : > { %v1512_v33 = vadd.f32 %v1511_v21, %v1510_v13 }
 0x1b2   : > { %v1476_v20 = vrot.slane %v1475_v16, 1  ;;  %v1555_v25 = vpop.permute.xlu0 %1554 }
 0x1b3   : > { %v1513_v22 = vrot.slane %v1512_v33, 1  ;;  %v1578_v15 = vmul.f32 %v1555_v25, %v3595_v27 }
 0x1b4   : > { %v3268_v54 = vadd.f32 %v1476_v20, %v1475_v16  ;;  %v1589_v36 = vpop.permute.xlu1 %1588 }
 0x1b5   : > { %v3270_v58 = vadd.f32 %v1513_v22, %v1512_v33  ;;  %v1617_v5 = vmul.f32 %v1589_v36, %v3619_v48  ;;  %v1618_v47 = vmul.f32 %v1589_v36, %v3620_v34 }
 0x1b6   : > { %v1665_v19 = vpop.permute.xlu0 %1664 }
 0x1b7   : > { %v1517_v18 = vcombine.low %v3268_v54, %v3270_v58  ;;  %v1633_v30 = vadd.f32 %v1617_v5, %v1569_v28  ;;  %v1634_v0 = vadd.f32 %v1618_v47, %v1570_v17  ;;  %v1693_v17 = vadd.f32 %v1665_v19, %v1637_v45 }
 0x1b8   : > { %v1593_v4 = vpop.permute.xlu1 %1592  ;;  %v1694_v62 = vadd.f32 %v1665_v19, %v1638_v50 }
 0x1b9   : > { %v1619_v41 = vmul.f32 %v1593_v4, %v3619_v48  ;;  %v1620_v6 = vmul.f32 %v1593_v4, %v3620_v34  ;;  %v1689_v9 = vadd.f32 %v1655_v52, %v1633_v30  ;;  %v1690_v55 = vadd.f32 %v1655_v52, %v1634_v0 }
 0x1ba   : > { %v1727_v14 = vpop.permute.xlu0 %1726  ;;  %v1577_v4 = vmul.f32 %v1555_v25, %v2641_v3  ;;  %v3623_v25 = vld [vmem:[#allocation13_spill] sm:$0xff]  ;;  %v1709_v39 = vmax.f32 %v1693_v17, 0.0  ;;  %v1710_v24 = vmax.f32 %v1694_v62, 0.0 }
 0x1bb   : > { %v1635_v43 = vadd.f32 %v1619_v41, %v1571_v51  ;;  %v1636_v60 = vadd.f32 %v1620_v6, %v1572_v2  ;;  %v1705_v21 = vmax.f32 %v1689_v9, 0.0  ;;  %v1706_v16 = vmax.f32 %v1690_v55, 0.0 }
 0x1bc   : > { %v1627_v0 = vmul.f32 %v3623_v25, %v3619_v48 }
 0x1bd   : > { %v1650_v56 = vpop.permute.xlu1 %1649  ;;  %v1761_v29 = vmul.f32 %v1727_v14, %v1705_v21  ;;  %v1762_v31 = vmul.f32 %v1727_v14, %v1706_v16 }
 0x1be   : > { %v1687_v46 = vadd.f32 %v1650_v56, %v1631_v63  ;;  %v1688_v12 = vadd.f32 %v1650_v56, %v1632_v35  ;;  %v1565_v53 = vpop.permute.xlu0 %1564 }
 0x1c0   : > { %v1703_v33 = vmax.f32 %v1687_v46, 0.0  ;;  %v1704_v20 = vmax.f32 %v1688_v12, 0.0  ;;  %v1581_v46 = vmul.f32 %v1565_v53, %v2641_v3  ;;  %v1582_v12 = vmul.f32 %v1565_v53, %v3595_v27 }
 0x1c2   : > { %v1601_v10 = vpop.permute.xlu1 %1600 }
 0x1c3   : > { %v1623_v22 = vmul.f32 %v1601_v10, %v3619_v48  ;;  %v1624_v36 = vmul.f32 %v1601_v10, %v3620_v34 }
 0x1c5   : > { %v1639_v23 = vadd.f32 %v1623_v22, %v1575_v1  ;;  %v1640_v10 = vadd.f32 %v1624_v36, %v1576_v11 }
 0x1c7   : > { %v1660_v7 = vpop.permute.xlu1 %1659 }
 0x1c8   : > { %v1691_v37 = vadd.f32 %v1660_v7, %v1635_v43  ;;  %v1692_v13 = vadd.f32 %v1660_v7, %v1636_v60  ;;  %v1737_v7 = vpop.permute.xlu0 %1736 }
 0x1c9   : > { %v1765_v60 = vmul.f32 %v1737_v7, %v1709_v39 }
 0x1ca   : > { %v1707_v5 = vmax.f32 %v1691_v37, 0.0  ;;  %v1708_v44 = vmax.f32 %v1692_v13, 0.0 }
 0x1cc   : > { %v1605_v8 = vpop.permute.xlu1 %1604  ;;  %v1742_v57 = vpop.permute.xlu0 %1741 }
 0x1cd   : > { %v1625_v56 = vmul.f32 %v1605_v8, %v3619_v48  ;;  %v1626_v32 = vmul.f32 %v1605_v8, %v3620_v34  ;;  %v1628_v8 = vmul.f32 %v3623_v25, %v3620_v34 }
 0x1cf   : > { %v1641_v41 = vadd.f32 %v1625_v56, %v1577_v4  ;;  %v1642_v6 = vadd.f32 %v1626_v32, %v1578_v15 }
 0x1d1   : > { %v1722_v26 = vpop.permute.xlu1 %1721 }
 0x1d2   : > { %v1759_v47 = vmul.f32 %v1722_v26, %v1703_v33  ;;  %v1760_v28 = vmul.f32 %v1722_v26, %v1704_v20 }
 0x1d4   : > { %v1775_v63 = vadd.f32 %v1761_v29, %v1759_v47  ;;  %v1788_v35 = vadd.f32 %v1762_v31, %v1760_v28 }
 0x1d5   : > { %v3276_v40 = vpop.permute.xlu1 %1559 }
 0x1d6   : > { %v1579_v19 = vmul.f32 %v3276_v40, %v2641_v3  ;;  %v1580_v14 = vmul.f32 %v3276_v40, %v3595_v27  ;;  %v1747_v27 = vpop.permute.xlu0 %1746 }
 0x1d8   : > { %v1643_v1 = vadd.f32 %v1627_v0, %v1579_v19  ;;  %v1644_v11 = vadd.f32 %v1628_v8, %v1580_v14  ;;  %v3624_v0 = vld [vmem:[#allocation38_spill] sm:$0xff]  ;;  %v3625_v8 = vld [vmem:[#allocation8_spill] sm:$0xff] }
 0x1da   : > { %v1670_v49 = vpop.permute.xlu1 %1669 }
 0x1db   : > { %v1695_v59 = vadd.f32 %v1670_v49, %v1639_v23  ;;  %v1696_v26 = vadd.f32 %v1670_v49, %v1640_v10  ;;  %v1757_v23 = vpop.permute.xlu0 %1756 }
 0x1dd   : > { %v1711_v45 = vmax.f32 %v1695_v59, 0.0  ;;  %v1712_v50 = vmax.f32 %v1696_v26, 0.0  ;;  %v3626_v26 = vld [vmem:[#allocation14_spill] sm:$0xff] }
 0x1de   : > { %v1732_v61 = vpop.permute.xlu1 %1731 }
 0x1df   : > { %v1763_v38 = vmul.f32 %v1732_v61, %v1707_v5  ;;  %v1764_v30 = vmul.f32 %v1732_v61, %v1708_v44  ;;  %v1766_v61 = vmul.f32 %v1737_v7, %v1710_v24  ;;  %v1767_v53 = vmul.f32 %v1742_v57, %v1711_v45 }
 0x1e0   : > { %v2039_v45 = vmov 1966171168  }
 0x1e1   : > { %v1776_v9 = vadd.f32 %v1775_v63, %v1763_v38  ;;  %v1789_v55 = vadd.f32 %v1788_v35, %v1764_v30  ;;  %v2038_v35 = vmov 1983009808  }
 0x1e2   : > { %v1519_v59 = vunpack.c.l.s4 %v2038_v35 }
 0x1e3   : > { %v1613_v52 = vpop.permute.xlu1 %1612  ;;  %v1777_v21 = vadd.f32 %v1776_v9, %v1765_v60  ;;  %v1790_v16 = vadd.f32 %v1789_v55, %v1766_v61  ;;  %v3627_v60 = vld [vmem:[#allocation35_spill] sm:$0xff] }
 0x1e4   : > { %v1629_v49 = vmul.f32 %v1613_v52, %v3619_v48  ;;  %v1630_v43 = vmul.f32 %v1613_v52, %v3620_v34  ;;  %v1768_v48 = vmul.f32 %v1742_v57, %v1712_v50  ;;  %v1520_v57 = vunpack.c.0.s8 %v1519_v59 }
 0x1e5   : > { %v1778_v32 = vadd.f32 %v1777_v21, %v1767_v53  ;;  %v1815_v50 = vunpack.c.l.s4 %v2039_v45 }
 0x1e6   : > { %v1645_v3 = vadd.f32 %v1629_v49, %v1581_v46  ;;  %v1646_v22 = vadd.f32 %v1630_v43, %v1582_v12  ;;  %v1791_v52 = vadd.f32 %v1790_v16, %v1768_v48  ;;  %v1523_v61 = vsub.s32 %v1520_v57, %v3627_v60 }
 0x1e8   : > { %v1675_v42 = vpop.permute.xlu1 %1674 }
 0x1e9   : > { %v1697_v51 = vadd.f32 %v1675_v42, %v1641_v41  ;;  %v1698_v2 = vadd.f32 %v1675_v42, %v1642_v6  ;;  %v395_v41 = vrot.slane %v3625_v8, %v3624_v0  ;;  %v386_v42 = vrot.slane %v3626_v26, %v3624_v0 }
 0x1eb   : > { %v1713_v37 = vmax.f32 %v1697_v51, 0.0  ;;  %v1714_v13 = vmax.f32 %v1698_v2, 0.0  ;;  %v1971_v51 = vld [vmem:[%s2599_s30] sm:$0xf]  ;;  %s1905_s30 = sshll.u32 %s245_s19, 1 }
 0x1ec   : > { %v1680_v40 = vpop.permute.xlu1 %1679  ;;  %v396_v2 = vmul.f32 %v1971_v51, %v395_v41  ;;  %v387_v9 = vmul.f32 %v1971_v51, %v386_v42  ;;  %s247_s21 = scalar_lea.vmem [#allocation3], %s1905_s30 }
 0x1ed   : > { %v1699_v33 = vadd.f32 %v1680_v40, %v1643_v1  ;;  %v1700_v20 = vadd.f32 %v1680_v40, %v1644_v11  ;;  %v1769_v34 = vmul.f32 %v1747_v27, %v1713_v37  ;;  %v1770_v4 = vmul.f32 %v1747_v27, %v1714_v13  ;;  %v3628_v1 = vld [vmem:[#allocation7_spill] sm:$0xff]  ;;  %s1842_s22 = sshll.u32 %s247_s21, 4  ;;  %s3336_s22 = int_to_ptr.vmem [resolvable:$true] %s1842_s22 }
 0x1ee   : > { %v1908_v12 = vrot.slane %v396_v2, 9  ;;  %v410_v11 = vrot.slane %v3628_v1, %v3624_v0  ;;  %s1972_s12 = scalar_lea.vmem %s3336_s22, 32  ;;  %p1979_p0 = scmp.lt.s32.totalorder %s3336_s22, %s1977_s13 }
 0x1ef   : > { %v1715_v7 = vmax.f32 %v1699_v33, 0.0  ;;  %v1716_v5 = vmax.f32 %v1700_v20, 0.0  ;;  %v1779_v29 = vadd.f32 %v1778_v32, %v1769_v34  ;;  %v1792_v31 = vadd.f32 %v1791_v52, %v1770_v4  ;;  %p1973_p11 = scmp.ne.s32.totalorder %s3336_s22, %s1972_s12  ;;  %p1980_p1 = scmp.lt.s32.totalorder %s1978_s14, %s1972_s12 }
 0x1f0   : > { %v1685_v36 = vpop.permute.xlu1 %1684  ;;  %v401_v40 = vadd.f32 %v1908_v12, %v387_v9  ;;  %v1524_v33 = vrot.slane %v1517_v18, %v1523_v61  ;;  %v1816_v20 = vunpack.c.0.s8 %v1815_v50  ;;  %v3629_v34 = vlaneseq }
 0x1f1   : > { %v1701_v15 = vadd.f32 %v1685_v36, %v1645_v3  ;;  %v1702_v56 = vadd.f32 %v1685_v36, %v1646_v22  ;;  %p1974_p12 = pnand %p1973_p11, %p2117_p5  ;;  %p1981_p2 = por %p1980_p1, %p1979_p0 }
 0x1f2   : > { %v411_v3 = vadd.f32 %v410_v11, %v401_v40  ;;  %v1819_v48 = vsub.s32 %v1816_v20, %v3627_v60  ;;  %vm1824_vm0 = vcmp.lt.s32.totalorder %v3629_v34, 256 }
 0x1f3   : > { %v1717_v44 = vmax.f32 %v1701_v15, 0.0  ;;  %v1718_v47 = vmax.f32 %v1702_v56, 0.0  ;;  %p1975_p13 = pneg %p1974_p12 }
 0x1f4   : > { %v1752_v28 = vpop.permute.xlu1 %1751  ;;  %v1526_v27 = vadd.f32 %v1524_v33, %v411_v3 }
 0x1f5   : > { %v1771_v17 = vmul.f32 %v1752_v28, %v1715_v7  ;;  %v1772_v62 = vmul.f32 %v1752_v28, %v1716_v5  ;;  %v1773_v10 = vmul.f32 %v1757_v23, %v1717_v44  ;;  %v1774_v38 = vmul.f32 %v1757_v23, %v1718_v47  ;;  %p1982_p3 = pnand %p1981_p2, %p1975_p13 }
 0x1f7   : > { %v1780_v30 = vadd.f32 %v1779_v29, %v1771_v17  ;;  %v1793_v25 = vadd.f32 %v1792_v31, %v1772_v62 }
 0x1f9   : > { %v1781_v6 = vadd.f32 %v1780_v30, %v1773_v10  ;;  %v1794_v63 = vadd.f32 %v1793_v25, %v1774_v38 }
 0x1fb   : > { %v1782_v19 = vrot.slane %v1781_v6, 4  ;;  %v1795_v14 = vrot.slane %v1794_v63, 4 }
 0x1fd   : > { %v1783_v39 = vadd.f32 %v1782_v19, %v1781_v6  ;;  %v1796_v24 = vadd.f32 %v1795_v14, %v1794_v63 }
 0x1ff   : > { %v1784_v55 = vrot.slane %v1783_v39, 2  ;;  %v1797_v46 = vrot.slane %v1796_v24, 2 }
 0x201   : > { %v1785_v49 = vadd.f32 %v1784_v55, %v1783_v39  ;;  %v1798_v43 = vadd.f32 %v1797_v46, %v1796_v24 }
 0x203   : > { %v1786_v37 = vrot.slane %v1785_v49, 1  ;;  %v1799_v13 = vrot.slane %v1798_v43, 1 }
 0x205   : > { %v1787_v21 = vadd.f32 %v1786_v37, %v1785_v49  ;;  %v1800_v16 = vadd.f32 %v1799_v13, %v1798_v43 }
 0x207   : > { %v1803_v22 = vcombine.low %v1787_v21, %v1800_v16 }
 0x209   : > { %v1810_v53 = vrot.slane %v1803_v22, %v1523_v61 }
 0x20b   : > { %v1812_v36 = vadd.f32 %v1810_v53, %v1526_v27 }
 0x20d   : > { %v1820_v4 = vrot.slane %v1812_v36, %v1819_v48 }
 0x20f   : > { %1826 = vst.msk [vmem:[%s247_s21] sm:$0x3] %vm1824_vm0, %v1820_v4 }
 0x210   : > { %1985 = shalt.err (!%p1982_p3)
}
 0x211   : > { %s1986_s15 = scalar_lea.hbm %s3334_s10, 32  ;;  %s1990_s18 = scalar_lea.hbm %s3382_s6, 64 }
 0x212   : > { %p1987_p4 = scmp.ne.s32.totalorder %s3334_s10, %s1986_s15  ;;  %p1991_p9 = scmp.lt.u32.totalorder %s3334_s10, %s3382_s6 }
 0x213   : > { %p1992_p10 = scmp.lt.u32.totalorder %s1990_s18, %s1986_s15  ;;  %p1994_p12 = scmp.lt.u32.totalorder %s1986_s15, %s3334_s10 }
 0x214   : > { %p1988_p7 = pnand %p1987_p4, %p2117_p5 }
 0x215   : > { %p1993_p11 = por %p1992_p10, %p1991_p9 }
 0x216   : > { %p1989_p8 = pneg %p1988_p7 }
 0x217   : > { %p1995_p13 = por %p1994_p12, %p1993_p11 }
 0x219   : > { %p1996_p0 = pnand %p1995_p13, %p1989_p8 }
 0x21b   : > { %1999 = shalt.err (!%p1996_p0)
}
 0x21c   : > { %1915 = dma.vmem_to_hbm [thread:$0]  (%p2117_p5), %s3336_s22, 32, %s3334_s10, %s1828_s11  }
 0x21d PF: > { %p1921_p1 = scmp.ge.s32.totalorder %s2034_s26, 2  ;;  %s1854_s20 = sand.u32 1, %s2022_s23  }
 0x21e   : > { %s1855_s21 = scalar_lea.sflag [#allocation4], %s1854_s20 }
 0x21f   : > { %p1918_p2 = pnand %p1921_p1, %p2121_p6 }
 0x221   : > { %2017 = dma.done.wait (!%p1918_p2), %s1855_s21, 32  }
 0x222   : > { %2019 = vsyncadd (!%p1918_p2), %s1855_s21, 4294967264  ;;  %p18_p3 = scmp.ge.s32.totalorder %s2104_s28, 4   ;;  %s3630_s23 = smov %s2026_s24 }
 0x223   : > { %s3631_s24 = smov %s2030_s25  ;;  %s3632_s25 = smov %s2115_s7 }
 0x224   : > { %s3633_s26 = smov %s2104_s28  ;;  %20 = sbr.rel (!%p18_p3) target bundleno = 6 (0x6), region = 79 }
 0x22b   :  { %1860 = vsyncpa [#allocation4], 1 }
 0x22c   :  { %1862 = vsyncpa [#allocation4 + $0x1], 1 }

</bundles_post_ra>
